<compile_context>
chip_gen: v7x
topology: tpu7x:2x2x1
jax: 0.10.0
libtpu: 0.0.40
codegen_flags: <defaults>
</compile_context>

<pallas_src>
import numpy as np
import jax
import jax.numpy as jnp
from jax import lax
from jax.experimental import pallas as pl
from jax.experimental.pallas import tpu as pltpu


def _tap_plan(H, W, dilations):
    """Static list of (branch_idx, ky, kx, dy, dx) for every non-center tap of
    the dilated 3x3 convs whose offset can still land inside the image."""
    plan = []
    for bi, d in enumerate(dilations):
        for ky in range(3):
            for kx in range(3):
                dy, dx = (ky - 1) * d, (kx - 1) * d
                if dy == 0 and dx == 0:
                    continue                      # center tap == x itself
                if abs(dy) >= H or abs(dx) >= W:
                    continue                      # only ever reads zero padding
                plan.append((bi, ky, kx, dy, dx))
    return plan


def pack_hrfs_aspp_params(params, H, W, dilations=(6, 12, 18)):
    """One-time host-side (numpy) packing of the module parameters.

    Composes the fusion 1x1 conv into the stage-1 weights (valid because there
    is no per-branch nonlinearity between out1..out4 and the fusion conv)."""
    np32 = lambda a: np.asarray(a, np.float32)
    w1, b1 = np32(params["w1"]), np32(params["b1"])
    wr, br = np32(params["wr"]), np32(params["br"])
    w5, b5 = np32(params["w5"]), np32(params["b5"])
    wf, bf = np32(params["wf"]), np32(params["bf"])
    dil_w = [np32(params["w2"]), np32(params["w3"]), np32(params["w4"])]
    dil_b = [np32(params["b2"]), np32(params["b3"]), np32(params["b4"])]

    Cout, Cin = w1.shape
    assert Cout == 32, "GroupNorm(32, Cout): per-channel norm requires Cout == 32"
    P = H * W
    plan = _tap_plan(H, W, dilations)
    T = len(plan)
    Kbig = Cin * (1 + T)

    # Branch-block weight (4*Cout, Kbig):
    #   column block 0   : the un-shifted image  (1x1 weights + all center taps)
    #   column block t+1 : the t-th shifted/masked tap (its own Cin columns)
    wbr = np.zeros((4 * Cout, Kbig), np.float32)
    wbr[0:Cout, 0:Cin] = w1
    for bi in range(len(dilations)):
        wbr[(bi + 1) * Cout:(bi + 2) * Cout, 0:Cin] = dil_w[bi][:, :, 1, 1]
    for t, (bi, ky, kx, dy, dx) in enumerate(plan):
        wbr[(bi + 1) * Cout:(bi + 2) * Cout,
            Cin * (1 + t):Cin * (2 + t)] = dil_w[bi][:, :, ky, kx]
    bbr = np.concatenate([b1] + dil_b)                         # (4*Cout,)

    # Fold the (linear) fusion conv into stage 1.
    w_direct = wf[:, :4 * Cout] @ wbr                          # (Cout, Kbig)
    b_direct = wf[:, :4 * Cout] @ bbr + bf                     # (Cout,)

    # Stage-1 weight = [fused-direct ; residual]   (2*Cout, Kbig)
    w_stage1 = np.zeros((2 * Cout, Kbig), np.float32)
    w_stage1[0:Cout, :] = w_direct
    w_stage1[Cout:2 * Cout, 0:Cin] = wr
    b_stage1 = np.concatenate([b_direct, br]).reshape(2 * Cout, 1)

    # Static border-validity masks, pre-broadcast over Cin so the kernel applies
    # them with a single element-wise multiply per tap (no iota/compare chains,
    # no sublane broadcast).
    pos = np.arange(P)
    py, px = pos // W, pos % W
    masks = np.zeros((max(T, 1), Cin, P), np.float32)
    for t, (_, _, _, dy, dx) in enumerate(plan):
        valid = ((py + dy >= 0) & (py + dy < H) &
                 (px + dx >= 0) & (px + dx < W)).astype(np.float32)
        masks[t] = np.broadcast_to(valid, (Cin, P))

    return {
        "H": H, "W": W, "Cin": Cin, "Cout": Cout, "Kbig": Kbig,
        "tap_offsets": tuple((dy, dx) for _, _, _, dy, dx in plan),
        # bf16 MXU operand; accumulation stays f32 inside the kernel.
        "w_stage1": jnp.asarray(w_stage1, dtype=jnp.bfloat16),
        "b_stage1": jnp.asarray(b_stage1, dtype=jnp.float32),
        "w5": jnp.asarray(w5, dtype=jnp.float32),                  # (Cout, Cin)
        "b5": jnp.asarray(b5.reshape(Cout, 1), dtype=jnp.float32),
        "wf_pool": jnp.asarray(wf[:, 4 * Cout:], dtype=jnp.float32),  # (Cout, Cout)
        "gamma": jnp.asarray(np32(params["gamma"]).reshape(Cout, 1)),
        "beta": jnp.asarray(np32(params["beta"]).reshape(Cout, 1)),
        "masks": jnp.asarray(masks, dtype=jnp.float32),            # (T, Cin, P)
    }


def make_kernel(H, W, Cin, Cout, tap_offsets, eps=1e-5):
    P = H * W
    f32 = jnp.float32
    inv_P = 1.0 / float(P)

    def kernel(x_ref, masks_ref, w1_ref, b1_ref, w5_ref, b5_ref, wfp_ref,
               gam_ref, bet_ref, out_ref, xb_ref):
        x = x_ref[...]                                        # (Cin, P) f32

        # ---- tap matrix assembly into the (Kbig, P) f32 VMEM scratch --------
        # row block 0 = x itself; row block t+1 = tap t (lane-rolled + masked).
        xb_ref[0:Cin, :] = x
        for t, (dy, dx) in enumerate(tap_offsets):
            shift = (-(dy * W + dx)) % P        # result[:,p] = x[:, (p+off)%P]
            rolled = pltpu.roll(x, shift=shift, axis=1) if shift else x
            xb_ref[Cin * (t + 1):Cin * (t + 2), :] = rolled * masks_ref[t]

        # cast once after assembly (taps stored 8-row aligned as f32)
        x_big = xb_ref[...].astype(jnp.bfloat16)              # (Kbig, P)

        # ---- stage 1: [fused-pre-GN ; residual] in ONE bf16 MXU matmul ------
        s1 = jnp.dot(w1_ref[...], x_big,
                     preferred_element_type=f32) + b1_ref[...]   # (2*Cout, P)
        fused = s1[0:Cout, :]
        resid = s1[Cout:2 * Cout, :]

        # ---- global-pool branch from the pooled INPUT (conv & mean commute).
        # (With group size 1 this per-channel constant is cancelled by the
        #  GroupNorm mean-subtraction; kept for faithfulness to the module.)
        xbar = jnp.mean(x, axis=1, keepdims=True)              # (Cin, 1)
        g = jnp.maximum(
            jnp.dot(w5_ref[...], xbar, preferred_element_type=f32)
            + b5_ref[...], 0.0)                                # (Cout, 1)
        fused = fused + jnp.dot(wfp_ref[...], g, preferred_element_type=f32)

        # ---- GroupNorm(32, 32) == per-channel norm over spatial; single-pass
        #      statistics (sum & sum-of-squares). ------------------------------
        s = jnp.sum(fused, axis=1, keepdims=True)
        s2 = jnp.sum(fused * fused, axis=1, keepdims=True)
        mu = s * inv_P
        var = s2 * inv_P - mu * mu
        normed = (fused - mu) * lax.rsqrt(var + eps) * gam_ref[...] + bet_ref[...]

        out_ref[...] = (jnp.maximum(normed, 0.0) + resid).astype(out_ref.dtype)

    return kernel


def hrfs_aspp(x_nchw, packed, eps=1e-5):
    """Pallas HRFSASPP forward.  Input/output are NCHW (PyTorch convention)."""
    H, W = packed["H"], packed["W"]
    Cin, Cout, Kbig = packed["Cin"], packed["Cout"], packed["Kbig"]
    P = H * W
    N = x_nchw.shape[0]
    assert x_nchw.shape == (N, Cin, H, W)

    x_flat = x_nchw.astype(jnp.float32).reshape(N, Cin, P)   # NCHW flattened

    kernel = make_kernel(H, W, Cin, Cout, packed["tap_offsets"], eps)

    def const_spec(arr):
        nd = arr.ndim
        return pl.BlockSpec(arr.shape, lambda n, _nd=nd: (0,) * _nd)

    consts = (packed["masks"], packed["w_stage1"], packed["b_stage1"],
              packed["w5"], packed["b5"], packed["wf_pool"],
              packed["gamma"], packed["beta"])

    out = pl.pallas_call(
        kernel,
        out_shape=jax.ShapeDtypeStruct((N, Cout, P), jnp.float32),
        grid_spec=pltpu.PrefetchScalarGridSpec(
            num_scalar_prefetch=0,
            grid=(N,),
            in_specs=[pl.BlockSpec((None, Cin, P), lambda n: (n, 0, 0))]
                     + [const_spec(a) for a in consts],
            out_specs=pl.BlockSpec((None, Cout, P), lambda n: (n, 0, 0)),
            scratch_shapes=[pltpu.VMEM((Kbig, P), jnp.float32)],
        ),
        compiler_params=pltpu.CompilerParams(
            dimension_semantics=("parallel",)),
    )(x_flat, *consts)

    # (N, Cout, P) reshapes straight back to NCHW: no output transpose
    return out.reshape(N, Cout, H, W)


# ---------------------------- pure-JAX reference ----------------------------
def ref_forward(x, p, dilations=(6, 12, 18), eps=1e-5):
    N, Cin, H, W = x.shape
    Cout = p["w1"].shape[0]

    def conv1x1(inp, w, b):
        return jnp.einsum("nchw,oc->nohw", inp, w) + b.reshape(1, -1, 1, 1)

    def conv3x3(inp, w, b, d):
        y = lax.conv_general_dilated(
            inp, w, window_strides=(1, 1), padding=[(d, d), (d, d)],
            rhs_dilation=(d, d), dimension_numbers=("NCHW", "OIHW", "NCHW"))
        return y + b.reshape(1, -1, 1, 1)

    out1 = conv1x1(x, p["w1"], p["b1"])
    out2 = conv3x3(x, p["w2"], p["b2"], dilations[0])
    out3 = conv3x3(x, p["w3"], p["b3"], dilations[1])
    out4 = conv3x3(x, p["w4"], p["b4"], dilations[2])
    gp = jnp.mean(x, axis=(2, 3), keepdims=True)
    out5 = jnp.maximum(jnp.einsum("nchw,oc->nohw", gp, p["w5"])
                       + p["b5"].reshape(1, -1, 1, 1), 0.0)
    out5 = jnp.broadcast_to(out5, (N, Cout, H, W))  # bilinear of a 1x1 map == const
    resid = conv1x1(x, p["wr"], p["br"])

    concat = jnp.concatenate([out1, out2, out3, out4, out5], axis=1)
    fused = jnp.einsum("nchw,oc->nohw", concat, p["wf"]) + p["bf"].reshape(1, -1, 1, 1)

    mu = jnp.mean(fused, axis=(2, 3), keepdims=True)          # GroupNorm(32, 32)
    var = jnp.mean((fused - mu) ** 2, axis=(2, 3), keepdims=True)
    normed = (fused - mu) * lax.rsqrt(var + eps)
    normed = normed * p["gamma"].reshape(1, -1, 1, 1) + p["beta"].reshape(1, -1, 1, 1)
    return jnp.maximum(normed, 0.0) + resid


if __name__ == "__main__":
    N, Cin, Cout, H, W = 2, 8, 32, 16, 16

    key = jax.random.PRNGKey(0)
    keys = jax.random.split(key, 20)

    def init(k, shape, scale=0.1):
        return jax.random.normal(k, shape, jnp.float32) * scale

    params = {
        "w1": init(keys[0], (Cout, Cin)),        "b1": init(keys[1], (Cout,)),
        "w2": init(keys[2], (Cout, Cin, 3, 3)),  "b2": init(keys[3], (Cout,)),
        "w3": init(keys[4], (Cout, Cin, 3, 3)),  "b3": init(keys[5], (Cout,)),
        "w4": init(keys[6], (Cout, Cin, 3, 3)),  "b4": init(keys[7], (Cout,)),
        "w5": init(keys[8], (Cout, Cin)),        "b5": init(keys[9], (Cout,)),
        "wr": init(keys[10], (Cout, Cin)),       "br": init(keys[11], (Cout,)),
        "wf": init(keys[12], (Cout, 5 * Cout)),  "bf": init(keys[13], (Cout,)),
        "gamma": 1.0 + init(keys[14], (Cout,), 0.05),
        "beta": init(keys[15], (Cout,), 0.05),
    }

    x = jax.random.normal(keys[16], (N, Cin, H, W), jnp.float32)   # NCHW input

    packed = pack_hrfs_aspp_params(params, H, W)     # host packing: once per param set
    out = jax.block_until_ready(hrfs_aspp(x, packed))
    ref = jax.block_until_ready(ref_forward(x, params))

    max_diff = float(jnp.max(jnp.abs(out - ref)))
    assert out.shape == (N, Cout, H, W), out.shape
    # bf16 MXU operands (f32 accumulation, f32 GroupNorm statistics) vs a pure-f32
    # reference -> slightly looser tolerance than a pure-f32 kernel would need.
    assert max_diff < 2e-2, f"mismatch vs reference: {max_diff}"

    print("KERNEL_OK")
</pallas_src>

<mosaic_0001>
module attributes {stable_mosaic.version = 11 : i64} {
  func.func @kernel(%arg0: i32, %arg1: memref<1x8x256xf32, #tpu.memory_space<vmem>>, %arg2: memref<16x8x256xf32, #tpu.memory_space<vmem>>, %arg3: memref<64x136xbf16, #tpu.memory_space<vmem>>, %arg4: memref<64x1xf32, #tpu.memory_space<vmem>>, %arg5: memref<32x8xf32, #tpu.memory_space<vmem>>, %arg6: memref<32x1xf32, #tpu.memory_space<vmem>>, %arg7: memref<32x32xf32, #tpu.memory_space<vmem>>, %arg8: memref<32x1xf32, #tpu.memory_space<vmem>>, %arg9: memref<32x1xf32, #tpu.memory_space<vmem>>, %arg10: memref<1x32x256xf32, #tpu.memory_space<vmem>>, %arg11: memref<136x256xf32, #tpu.memory_space<vmem>>) attributes {dimension_semantics = [#tpu.dimension_semantics<parallel>], iteration_bounds = array<i64: 2>, scalar_prefetch = 0 : i64, scratch_operands = 1 : i64, tpu.core_type = #tpu.core_type<tc>, window_params = [{transform_indices = @transform_0, window_bounds = array<i64: 1, 8, 256>}, {pipeline_mode = #tpu.pipeline_mode<synchronous>, transform_indices = @transform_1, window_bounds = array<i64: 16, 8, 256>}, {pipeline_mode = #tpu.pipeline_mode<synchronous>, transform_indices = @transform_2, window_bounds = array<i64: 64, 136>}, {pipeline_mode = #tpu.pipeline_mode<synchronous>, transform_indices = @transform_3, window_bounds = array<i64: 64, 1>}, {pipeline_mode = #tpu.pipeline_mode<synchronous>, transform_indices = @transform_4, window_bounds = array<i64: 32, 8>}, {pipeline_mode = #tpu.pipeline_mode<synchronous>, transform_indices = @transform_5, window_bounds = array<i64: 32, 1>}, {pipeline_mode = #tpu.pipeline_mode<synchronous>, transform_indices = @transform_6, window_bounds = array<i64: 32, 32>}, {pipeline_mode = #tpu.pipeline_mode<synchronous>, transform_indices = @transform_7, window_bounds = array<i64: 32, 1>}, {pipeline_mode = #tpu.pipeline_mode<synchronous>, transform_indices = @transform_8, window_bounds = array<i64: 32, 1>}, {transform_indices = @transform_9, window_bounds = array<i64: 1, 32, 256>}]} {
    %c0 = arith.constant 0 : index
    %c0_0 = arith.constant 0 : index
    %c0_1 = arith.constant 0 : index
    %0 = vector.load %arg1[%c0, %c0_0, %c0_1] : memref<1x8x256xf32, #tpu.memory_space<vmem>>, vector<1x8x256xf32>
    %1 = vector.shape_cast %0 : vector<1x8x256xf32> to vector<8x256xf32>
    %c0_2 = arith.constant 0 : index
    %c0_3 = arith.constant 0 : index
    %2 = vector.load %arg11[%c0_2, %c0_3] : memref<136x256xf32, #tpu.memory_space<vmem>>, vector<8x256xf32>
    tpu.vector_store %arg11[%c0_2, %c0_3], %1 {strides = array<i32>} : memref<136x256xf32, #tpu.memory_space<vmem>>, vector<8x256xf32>,
    %c102_i32 = arith.constant 102 : i32
    %3 = tpu.dynamic_rotate %1 by %c102_i32 dim 1 : vector<8x256xf32>, i32 -> vector<8x256xf32>
    %c0_4 = arith.constant 0 : index
    %c0_5 = arith.constant 0 : index
    %c0_6 = arith.constant 0 : index
    %4 = vector.load %arg2[%c0_4, %c0_5, %c0_6] : memref<16x8x256xf32, #tpu.memory_space<vmem>>, vector<1x8x256xf32>
    %5 = vector.shape_cast %4 : vector<1x8x256xf32> to vector<8x256xf32>
    %6 = arith.mulf %3, %5 : vector<8x256xf32>
    %c8 = arith.constant 8 : index
    %c0_7 = arith.constant 0 : index
    %7 = vector.load %arg11[%c8, %c0_7] : memref<136x256xf32, #tpu.memory_space<vmem>>, vector<8x256xf32>
    tpu.vector_store %arg11[%c8, %c0_7], %6 {strides = array<i32>} : memref<136x256xf32, #tpu.memory_space<vmem>>, vector<8x256xf32>,
    %c96_i32 = arith.constant 96 : i32
    %8 = tpu.dynamic_rotate %1 by %c96_i32 dim 1 : vector<8x256xf32>, i32 -> vector<8x256xf32>
    %c1 = arith.constant 1 : index
    %c0_8 = arith.constant 0 : index
    %c0_9 = arith.constant 0 : index
    %9 = vector.load %arg2[%c1, %c0_8, %c0_9] : memref<16x8x256xf32, #tpu.memory_space<vmem>>, vector<1x8x256xf32>
    %10 = vector.shape_cast %9 : vector<1x8x256xf32> to vector<8x256xf32>
    %11 = arith.mulf %8, %10 : vector<8x256xf32>
    %c16 = arith.constant 16 : index
    %c0_10 = arith.constant 0 : index
    %12 = vector.load %arg11[%c16, %c0_10] : memref<136x256xf32, #tpu.memory_space<vmem>>, vector<8x256xf32>
    tpu.vector_store %arg11[%c16, %c0_10], %11 {strides = array<i32>} : memref<136x256xf32, #tpu.memory_space<vmem>>, vector<8x256xf32>,
    %c90_i32 = arith.constant 90 : i32
    %13 = tpu.dynamic_rotate %1 by %c90_i32 dim 1 : vector<8x256xf32>, i32 -> vector<8x256xf32>
    %c2 = arith.constant 2 : index
    %c0_11 = arith.constant 0 : index
    %c0_12 = arith.constant 0 : index
    %14 = vector.load %arg2[%c2, %c0_11, %c0_12] : memref<16x8x256xf32, #tpu.memory_space<vmem>>, vector<1x8x256xf32>
    %15 = vector.shape_cast %14 : vector<1x8x256xf32> to vector<8x256xf32>
    %16 = arith.mulf %13, %15 : vector<8x256xf32>
    %c24 = arith.constant 24 : index
    %c0_13 = arith.constant 0 : index
    %17 = vector.load %arg11[%c24, %c0_13] : memref<136x256xf32, #tpu.memory_space<vmem>>, vector<8x256xf32>
    tpu.vector_store %arg11[%c24, %c0_13], %16 {strides = array<i32>} : memref<136x256xf32, #tpu.memory_space<vmem>>, vector<8x256xf32>,
    %c6_i32 = arith.constant 6 : i32
    %18 = tpu.dynamic_rotate %1 by %c6_i32 dim 1 : vector<8x256xf32>, i32 -> vector<8x256xf32>
    %c3 = arith.constant 3 : index
    %c0_14 = arith.constant 0 : index
    %c0_15 = arith.constant 0 : index
    %19 = vector.load %arg2[%c3, %c0_14, %c0_15] : memref<16x8x256xf32, #tpu.memory_space<vmem>>, vector<1x8x256xf32>
    %20 = vector.shape_cast %19 : vector<1x8x256xf32> to vector<8x256xf32>
    %21 = arith.mulf %18, %20 : vector<8x256xf32>
    %c32 = arith.constant 32 : index
    %c0_16 = arith.constant 0 : index
    %22 = vector.load %arg11[%c32, %c0_16] : memref<136x256xf32, #tpu.memory_space<vmem>>, vector<8x256xf32>
    tpu.vector_store %arg11[%c32, %c0_16], %21 {strides = array<i32>} : memref<136x256xf32, #tpu.memory_space<vmem>>, vector<8x256xf32>,
    %c250_i32 = arith.constant 250 : i32
    %23 = tpu.dynamic_rotate %1 by %c250_i32 dim 1 : vector<8x256xf32>, i32 -> vector<8x256xf32>
    %c4 = arith.constant 4 : index
    %c0_17 = arith.constant 0 : index
    %c0_18 = arith.constant 0 : index
    %24 = vector.load %arg2[%c4, %c0_17, %c0_18] : memref<16x8x256xf32, #tpu.memory_space<vmem>>, vector<1x8x256xf32>
    %25 = vector.shape_cast %24 : vector<1x8x256xf32> to vector<8x256xf32>
    %26 = arith.mulf %23, %25 : vector<8x256xf32>
    %c40 = arith.constant 40 : index
    %c0_19 = arith.constant 0 : index
    %27 = vector.load %arg11[%c40, %c0_19] : memref<136x256xf32, #tpu.memory_space<vmem>>, vector<8x256xf32>
    tpu.vector_store %arg11[%c40, %c0_19], %26 {strides = array<i32>} : memref<136x256xf32, #tpu.memory_space<vmem>>, vector<8x256xf32>,
    %c166_i32 = arith.constant 166 : i32
    %28 = tpu.dynamic_rotate %1 by %c166_i32 dim 1 : vector<8x256xf32>, i32 -> vector<8x256xf32>
    %c5 = arith.constant 5 : index
    %c0_20 = arith.constant 0 : index
    %c0_21 = arith.constant 0 : index
    %29 = vector.load %arg2[%c5, %c0_20, %c0_21] : memref<16x8x256xf32, #tpu.memory_space<vmem>>, vector<1x8x256xf32>
    %30 = vector.shape_cast %29 : vector<1x8x256xf32> to vector<8x256xf32>
    %31 = arith.mulf %28, %30 : vector<8x256xf32>
    %c48 = arith.constant 48 : index
    %c0_22 = arith.constant 0 : index
    %32 = vector.load %arg11[%c48, %c0_22] : memref<136x256xf32, #tpu.memory_space<vmem>>, vector<8x256xf32>
    tpu.vector_store %arg11[%c48, %c0_22], %31 {strides = array<i32>} : memref<136x256xf32, #tpu.memory_space<vmem>>, vector<8x256xf32>,
    %c160_i32 = arith.constant 160 : i32
    %33 = tpu.dynamic_rotate %1 by %c160_i32 dim 1 : vector<8x256xf32>, i32 -> vector<8x256xf32>
    %c6 = arith.constant 6 : index
    %c0_23 = arith.constant 0 : index
    %c0_24 = arith.constant 0 : index
    %34 = vector.load %arg2[%c6, %c0_23, %c0_24] : memref<16x8x256xf32, #tpu.memory_space<vmem>>, vector<1x8x256xf32>
    %35 = vector.shape_cast %34 : vector<1x8x256xf32> to vector<8x256xf32>
    %36 = arith.mulf %33, %35 : vector<8x256xf32>
    %c56 = arith.constant 56 : index
    %c0_25 = arith.constant 0 : index
    %37 = vector.load %arg11[%c56, %c0_25] : memref<136x256xf32, #tpu.memory_space<vmem>>, vector<8x256xf32>
    tpu.vector_store %arg11[%c56, %c0_25], %36 {strides = array<i32>} : memref<136x256xf32, #tpu.memory_space<vmem>>, vector<8x256xf32>,
    %c154_i32 = arith.constant 154 : i32
    %38 = tpu.dynamic_rotate %1 by %c154_i32 dim 1 : vector<8x256xf32>, i32 -> vector<8x256xf32>
    %c7 = arith.constant 7 : index
    %c0_26 = arith.constant 0 : index
    %c0_27 = arith.constant 0 : index
    %39 = vector.load %arg2[%c7, %c0_26, %c0_27] : memref<16x8x256xf32, #tpu.memory_space<vmem>>, vector<1x8x256xf32>
    %40 = vector.shape_cast %39 : vector<1x8x256xf32> to vector<8x256xf32>
    %41 = arith.mulf %38, %40 : vector<8x256xf32>
    %c64 = arith.constant 64 : index
    %c0_28 = arith.constant 0 : index
    %42 = vector.load %arg11[%c64, %c0_28] : memref<136x256xf32, #tpu.memory_space<vmem>>, vector<8x256xf32>
    tpu.vector_store %arg11[%c64, %c0_28], %41 {strides = array<i32>} : memref<136x256xf32, #tpu.memory_space<vmem>>, vector<8x256xf32>,
    %c204_i32 = arith.constant 204 : i32
    %43 = tpu.dynamic_rotate %1 by %c204_i32 dim 1 : vector<8x256xf32>, i32 -> vector<8x256xf32>
    %c8_29 = arith.constant 8 : index
    %c0_30 = arith.constant 0 : index
    %c0_31 = arith.constant 0 : index
    %44 = vector.load %arg2[%c8_29, %c0_30, %c0_31] : memref<16x8x256xf32, #tpu.memory_space<vmem>>, vector<1x8x256xf32>
    %45 = vector.shape_cast %44 : vector<1x8x256xf32> to vector<8x256xf32>
    %46 = arith.mulf %43, %45 : vector<8x256xf32>
    %c72 = arith.constant 72 : index
    %c0_32 = arith.constant 0 : index
    %47 = vector.load %arg11[%c72, %c0_32] : memref<136x256xf32, #tpu.memory_space<vmem>>, vector<8x256xf32>
    tpu.vector_store %arg11[%c72, %c0_32], %46 {strides = array<i32>} : memref<136x256xf32, #tpu.memory_space<vmem>>, vector<8x256xf32>,
    %c192_i32 = arith.constant 192 : i32
    %48 = tpu.dynamic_rotate %1 by %c192_i32 dim 1 : vector<8x256xf32>, i32 -> vector<8x256xf32>
    %c9 = arith.constant 9 : index
    %c0_33 = arith.constant 0 : index
    %c0_34 = arith.constant 0 : index
    %49 = vector.load %arg2[%c9, %c0_33, %c0_34] : memref<16x8x256xf32, #tpu.memory_space<vmem>>, vector<1x8x256xf32>
    %50 = vector.shape_cast %49 : vector<1x8x256xf32> to vector<8x256xf32>
    %51 = arith.mulf %48, %50 : vector<8x256xf32>
    %c80 = arith.constant 80 : index
    %c0_35 = arith.constant 0 : index
    %52 = vector.load %arg11[%c80, %c0_35] : memref<136x256xf32, #tpu.memory_space<vmem>>, vector<8x256xf32>
    tpu.vector_store %arg11[%c80, %c0_35], %51 {strides = array<i32>} : memref<136x256xf32, #tpu.memory_space<vmem>>, vector<8x256xf32>,
    %c180_i32 = arith.constant 180 : i32
    %53 = tpu.dynamic_rotate %1 by %c180_i32 dim 1 : vector<8x256xf32>, i32 -> vector<8x256xf32>
    %c10 = arith.constant 10 : index
    %c0_36 = arith.constant 0 : index
    %c0_37 = arith.constant 0 : index
    %54 = vector.load %arg2[%c10, %c0_36, %c0_37] : memref<16x8x256xf32, #tpu.memory_space<vmem>>, vector<1x8x256xf32>
    %55 = vector.shape_cast %54 : vector<1x8x256xf32> to vector<8x256xf32>
    %56 = arith.mulf %53, %55 : vector<8x256xf32>
    %c88 = arith.constant 88 : index
    %c0_38 = arith.constant 0 : index
    %57 = vector.load %arg11[%c88, %c0_38] : memref<136x256xf32, #tpu.memory_space<vmem>>, vector<8x256xf32>
    tpu.vector_store %arg11[%c88, %c0_38], %56 {strides = array<i32>} : memref<136x256xf32, #tpu.memory_space<vmem>>, vector<8x256xf32>,
    %c12_i32 = arith.constant 12 : i32
    %58 = tpu.dynamic_rotate %1 by %c12_i32 dim 1 : vector<8x256xf32>, i32 -> vector<8x256xf32>
    %c11 = arith.constant 11 : index
    %c0_39 = arith.constant 0 : index
    %c0_40 = arith.constant 0 : index
    %59 = vector.load %arg2[%c11, %c0_39, %c0_40] : memref<16x8x256xf32, #tpu.memory_space<vmem>>, vector<1x8x256xf32>
    %60 = vector.shape_cast %59 : vector<1x8x256xf32> to vector<8x256xf32>
    %61 = arith.mulf %58, %60 : vector<8x256xf32>
    %c96 = arith.constant 96 : index
    %c0_41 = arith.constant 0 : index
    %62 = vector.load %arg11[%c96, %c0_41] : memref<136x256xf32, #tpu.memory_space<vmem>>, vector<8x256xf32>
    tpu.vector_store %arg11[%c96, %c0_41], %61 {strides = array<i32>} : memref<136x256xf32, #tpu.memory_space<vmem>>, vector<8x256xf32>,
    %c244_i32 = arith.constant 244 : i32
    %63 = tpu.dynamic_rotate %1 by %c244_i32 dim 1 : vector<8x256xf32>, i32 -> vector<8x256xf32>
    %c12 = arith.constant 12 : index
    %c0_42 = arith.constant 0 : index
    %c0_43 = arith.constant 0 : index
    %64 = vector.load %arg2[%c12, %c0_42, %c0_43] : memref<16x8x256xf32, #tpu.memory_space<vmem>>, vector<1x8x256xf32>
    %65 = vector.shape_cast %64 : vector<1x8x256xf32> to vector<8x256xf32>
    %66 = arith.mulf %63, %65 : vector<8x256xf32>
    %c104 = arith.constant 104 : index
    %c0_44 = arith.constant 0 : index
    %67 = vector.load %arg11[%c104, %c0_44] : memref<136x256xf32, #tpu.memory_space<vmem>>, vector<8x256xf32>
    tpu.vector_store %arg11[%c104, %c0_44], %66 {strides = array<i32>} : memref<136x256xf32, #tpu.memory_space<vmem>>, vector<8x256xf32>,
    %c76_i32 = arith.constant 76 : i32
    %68 = tpu.dynamic_rotate %1 by %c76_i32 dim 1 : vector<8x256xf32>, i32 -> vector<8x256xf32>
    %c13 = arith.constant 13 : index
    %c0_45 = arith.constant 0 : index
    %c0_46 = arith.constant 0 : index
    %69 = vector.load %arg2[%c13, %c0_45, %c0_46] : memref<16x8x256xf32, #tpu.memory_space<vmem>>, vector<1x8x256xf32>
    %70 = vector.shape_cast %69 : vector<1x8x256xf32> to vector<8x256xf32>
    %71 = arith.mulf %68, %70 : vector<8x256xf32>
    %c112 = arith.constant 112 : index
    %c0_47 = arith.constant 0 : index
    %72 = vector.load %arg11[%c112, %c0_47] : memref<136x256xf32, #tpu.memory_space<vmem>>, vector<8x256xf32>
    tpu.vector_store %arg11[%c112, %c0_47], %71 {strides = array<i32>} : memref<136x256xf32, #tpu.memory_space<vmem>>, vector<8x256xf32>,
    %c64_i32 = arith.constant 64 : i32
    %73 = tpu.dynamic_rotate %1 by %c64_i32 dim 1 : vector<8x256xf32>, i32 -> vector<8x256xf32>
    %c14 = arith.constant 14 : index
    %c0_48 = arith.constant 0 : index
    %c0_49 = arith.constant 0 : index
    %74 = vector.load %arg2[%c14, %c0_48, %c0_49] : memref<16x8x256xf32, #tpu.memory_space<vmem>>, vector<1x8x256xf32>
    %75 = vector.shape_cast %74 : vector<1x8x256xf32> to vector<8x256xf32>
    %76 = arith.mulf %73, %75 : vector<8x256xf32>
    %c120 = arith.constant 120 : index
    %c0_50 = arith.constant 0 : index
    %77 = vector.load %arg11[%c120, %c0_50] : memref<136x256xf32, #tpu.memory_space<vmem>>, vector<8x256xf32>
    tpu.vector_store %arg11[%c120, %c0_50], %76 {strides = array<i32>} : memref<136x256xf32, #tpu.memory_space<vmem>>, vector<8x256xf32>,
    %c52_i32 = arith.constant 52 : i32
    %78 = tpu.dynamic_rotate %1 by %c52_i32 dim 1 : vector<8x256xf32>, i32 -> vector<8x256xf32>
    %c15 = arith.constant 15 : index
    %c0_51 = arith.constant 0 : index
    %c0_52 = arith.constant 0 : index
    %79 = vector.load %arg2[%c15, %c0_51, %c0_52] : memref<16x8x256xf32, #tpu.memory_space<vmem>>, vector<1x8x256xf32>
    %80 = vector.shape_cast %79 : vector<1x8x256xf32> to vector<8x256xf32>
    %81 = arith.mulf %78, %80 : vector<8x256xf32>
    %c128 = arith.constant 128 : index
    %c0_53 = arith.constant 0 : index
    %82 = vector.load %arg11[%c128, %c0_53] : memref<136x256xf32, #tpu.memory_space<vmem>>, vector<8x256xf32>
    tpu.vector_store %arg11[%c128, %c0_53], %81 {strides = array<i32>} : memref<136x256xf32, #tpu.memory_space<vmem>>, vector<8x256xf32>,
    %c0_54 = arith.constant 0 : index
    %c0_55 = arith.constant 0 : index
    %83 = vector.load %arg11[%c0_54, %c0_55] : memref<136x256xf32, #tpu.memory_space<vmem>>, vector<136x256xf32>
    %84 = arith.truncf %83 : vector<136x256xf32> to vector<136x256xbf16>
    %c0_56 = arith.constant 0 : index
    %c0_57 = arith.constant 0 : index
    %85 = vector.load %arg3[%c0_56, %c0_57] : memref<64x136xbf16, #tpu.memory_space<vmem>>, vector<64x136xbf16>
    %cst = arith.constant dense<0.000000e+00> : vector<64x256xf32>
    %86 = tpu.matmul %85, %84, %cst {dimension_numbers = #tpu.dot_dimension_numbers<[1], [0], [0], [1], [0, 0, 1, 1], [], []>} : vector<64x136xbf16>, vector<136x256xbf16>, vector<64x256xf32> -> vector<64x256xf32>
    %c0_58 = arith.constant 0 : index
    %c0_59 = arith.constant 0 : index
    %87 = vector.load %arg4[%c0_58, %c0_59] : memref<64x1xf32, #tpu.memory_space<vmem>>, vector<64x1xf32>
    %88 = vector.broadcast %87 : vector<64x1xf32> to vector<64x256xf32>
    %89 = arith.addf %86, %88 : vector<64x256xf32>
    %90 = vector.extract_strided_slice %89 {offsets = [0, 0], sizes = [32, 256], strides = [1, 1]} : vector<64x256xf32> to vector<32x256xf32>
    %91 = vector.extract_strided_slice %89 {offsets = [32, 0], sizes = [32, 256], strides = [1, 1]} : vector<64x256xf32> to vector<32x256xf32>
    %cst_60 = arith.constant dense<0.000000e+00> : vector<8xf32>
    %92 = vector.multi_reduction <add>, %1, %cst_60 [1] : vector<8x256xf32> to vector<8xf32>
    %93 = vector.shape_cast %92 : vector<8xf32> to vector<8x1xf32>
    %cst_61 = arith.constant 2.560000e+02 : f32
    %94 = vector.broadcast %cst_61 : f32 to vector<8x1xf32>
    %95 = arith.divf %93, %94 : vector<8x1xf32>
    %c0_62 = arith.constant 0 : index
    %c0_63 = arith.constant 0 : index
    %96 = vector.load %arg5[%c0_62, %c0_63] : memref<32x8xf32, #tpu.memory_space<vmem>>, vector<32x8xf32>
    %cst_64 = arith.constant dense<0.000000e+00> : vector<32x1xf32>
    %97 = tpu.matmul %96, %95, %cst_64 {dimension_numbers = #tpu.dot_dimension_numbers<[1], [0], [0], [1], [0, 0, 1, 1], [], []>} : vector<32x8xf32>, vector<8x1xf32>, vector<32x1xf32> -> vector<32x1xf32>
    %c0_65 = arith.constant 0 : index
    %c0_66 = arith.constant 0 : index
    %98 = vector.load %arg6[%c0_65, %c0_66] : memref<32x1xf32, #tpu.memory_space<vmem>>, vector<32x1xf32>
    %99 = arith.addf %97, %98 : vector<32x1xf32>
    %cst_67 = arith.constant 0.000000e+00 : f32
    %100 = vector.broadcast %cst_67 : f32 to vector<32x1xf32>
    %101 = arith.maximumf %99, %100 : vector<32x1xf32>
    %c0_68 = arith.constant 0 : index
    %c0_69 = arith.constant 0 : index
    %102 = vector.load %arg7[%c0_68, %c0_69] : memref<32x32xf32, #tpu.memory_space<vmem>>, vector<32x32xf32>
    %cst_70 = arith.constant dense<0.000000e+00> : vector<32x1xf32>
    %103 = tpu.matmul %102, %101, %cst_70 {dimension_numbers = #tpu.dot_dimension_numbers<[1], [0], [0], [1], [0, 0, 1, 1], [], []>} : vector<32x32xf32>, vector<32x1xf32>, vector<32x1xf32> -> vector<32x1xf32>
    %104 = vector.broadcast %103 : vector<32x1xf32> to vector<32x256xf32>
    %105 = arith.addf %90, %104 : vector<32x256xf32>
    %cst_71 = arith.constant dense<0.000000e+00> : vector<32xf32>
    %106 = vector.multi_reduction <add>, %105, %cst_71 [1] : vector<32x256xf32> to vector<32xf32>
    %107 = vector.shape_cast %106 : vector<32xf32> to vector<32x1xf32>
    %108 = arith.mulf %105, %105 : vector<32x256xf32>
    %cst_72 = arith.constant dense<0.000000e+00> : vector<32xf32>
    %109 = vector.multi_reduction <add>, %108, %cst_72 [1] : vector<32x256xf32> to vector<32xf32>
    %110 = vector.shape_cast %109 : vector<32xf32> to vector<32x1xf32>
    %cst_73 = arith.constant 3.906250e-03 : f32
    %111 = vector.broadcast %cst_73 : f32 to vector<32x1xf32>
    %112 = arith.mulf %107, %111 : vector<32x1xf32>
    %cst_74 = arith.constant 3.906250e-03 : f32
    %113 = vector.broadcast %cst_74 : f32 to vector<32x1xf32>
    %114 = arith.mulf %110, %113 : vector<32x1xf32>
    %115 = arith.mulf %112, %112 : vector<32x1xf32>
    %116 = arith.subf %114, %115 : vector<32x1xf32>
    %117 = vector.broadcast %112 : vector<32x1xf32> to vector<32x256xf32>
    %118 = arith.subf %105, %117 : vector<32x256xf32>
    %cst_75 = arith.constant 9.99999974E-6 : f32
    %119 = vector.broadcast %cst_75 : f32 to vector<32x1xf32>
    %120 = arith.addf %116, %119 : vector<32x1xf32>
    %121 = math.rsqrt %120 : vector<32x1xf32>
    %122 = vector.broadcast %121 : vector<32x1xf32> to vector<32x256xf32>
    %123 = arith.mulf %118, %122 : vector<32x256xf32>
    %c0_76 = arith.constant 0 : index
    %c0_77 = arith.constant 0 : index
    %124 = vector.load %arg8[%c0_76, %c0_77] : memref<32x1xf32, #tpu.memory_space<vmem>>, vector<32x1xf32>
    %125 = vector.broadcast %124 : vector<32x1xf32> to vector<32x256xf32>
    %126 = arith.mulf %123, %125 : vector<32x256xf32>
    %c0_78 = arith.constant 0 : index
    %c0_79 = arith.constant 0 : index
    %127 = vector.load %arg9[%c0_78, %c0_79] : memref<32x1xf32, #tpu.memory_space<vmem>>, vector<32x1xf32>
    %128 = vector.broadcast %127 : vector<32x1xf32> to vector<32x256xf32>
    %129 = arith.addf %126, %128 : vector<32x256xf32>
    %cst_80 = arith.constant 0.000000e+00 : f32
    %130 = vector.broadcast %cst_80 : f32 to vector<32x256xf32>
    %131 = arith.maximumf %129, %130 : vector<32x256xf32>
    %132 = arith.addf %131, %91 : vector<32x256xf32>
    %c0_81 = arith.constant 0 : index
    %c0_82 = arith.constant 0 : index
    %c0_83 = arith.constant 0 : index
    %133 = vector.load %arg10[%c0_81, %c0_82, %c0_83] : memref<1x32x256xf32, #tpu.memory_space<vmem>>, vector<1x32x256xf32>
    %134 = vector.shape_cast %133 : vector<1x32x256xf32> to vector<32x256xf32>
    %135 = vector.shape_cast %132 : vector<32x256xf32> to vector<1x32x256xf32>
    tpu.vector_store %arg10[%c0_81, %c0_82, %c0_83], %135 {strides = array<i32>} : memref<1x32x256xf32, #tpu.memory_space<vmem>>, vector<1x32x256xf32>,
    return
  }
  func.func @transform_0(%arg0: i32) -> (i32, i32, i32) {
    %c0_i32 = arith.constant 0 : i32
    %c0_i32_0 = arith.constant 0 : i32
    %c0_i32_1 = arith.constant 0 : i32
    return %arg0, %c0_i32, %c0_i32_0 : i32, i32, i32
  }
  func.func @transform_1(%arg0: i32) -> (i32, i32, i32) {
    %c0_i32 = arith.constant 0 : i32
    %c0_i32_0 = arith.constant 0 : i32
    %c0_i32_1 = arith.constant 0 : i32
    %c0_i32_2 = arith.constant 0 : i32
    return %c0_i32, %c0_i32_0, %c0_i32_1 : i32, i32, i32
  }
  func.func @transform_2(%arg0: i32) -> (i32, i32) {
    %c0_i32 = arith.constant 0 : i32
    %c0_i32_0 = arith.constant 0 : i32
    %c0_i32_1 = arith.constant 0 : i32
    return %c0_i32, %c0_i32_0 : i32, i32
  }
  func.func @transform_3(%arg0: i32) -> (i32, i32) {
    %c0_i32 = arith.constant 0 : i32
    %c0_i32_0 = arith.constant 0 : i32
    %c0_i32_1 = arith.constant 0 : i32
    return %c0_i32, %c0_i32_0 : i32, i32
  }
  func.func @transform_4(%arg0: i32) -> (i32, i32) {
    %c0_i32 = arith.constant 0 : i32
    %c0_i32_0 = arith.constant 0 : i32
    %c0_i32_1 = arith.constant 0 : i32
    return %c0_i32, %c0_i32_0 : i32, i32
  }
  func.func @transform_5(%arg0: i32) -> (i32, i32) {
    %c0_i32 = arith.constant 0 : i32
    %c0_i32_0 = arith.constant 0 : i32
    %c0_i32_1 = arith.constant 0 : i32
    return %c0_i32, %c0_i32_0 : i32, i32
  }
  func.func @transform_6(%arg0: i32) -> (i32, i32) {
    %c0_i32 = arith.constant 0 : i32
    %c0_i32_0 = arith.constant 0 : i32
    %c0_i32_1 = arith.constant 0 : i32
    return %c0_i32, %c0_i32_0 : i32, i32
  }
  func.func @transform_7(%arg0: i32) -> (i32, i32) {
    %c0_i32 = arith.constant 0 : i32
    %c0_i32_0 = arith.constant 0 : i32
    %c0_i32_1 = arith.constant 0 : i32
    return %c0_i32, %c0_i32_0 : i32, i32
  }
  func.func @transform_8(%arg0: i32) -> (i32, i32) {
    %c0_i32 = arith.constant 0 : i32
    %c0_i32_0 = arith.constant 0 : i32
    %c0_i32_1 = arith.constant 0 : i32
    return %c0_i32, %c0_i32_0 : i32, i32
  }
  func.func @transform_9(%arg0: i32) -> (i32, i32, i32) {
    %c0_i32 = arith.constant 0 : i32
    %c0_i32_0 = arith.constant 0 : i32
    %c0_i32_1 = arith.constant 0 : i32
    return %arg0, %c0_i32, %c0_i32_0 : i32, i32, i32
  }
}

</mosaic_0001>

<bundles_post_ra>
// kernel: tpu_custom_call.1
= control target key start
LH: loop header
LB: loop body
LE: loop exit
PB: predicated region body
PF: predicated region fallthrough
CT: control target
= control target key end

     0   :  { %14 = vsyncpa [#allocation4], 0  ;;  %s2062_s0 = inlined_call_operand.vmem [shape: f32[2,8,256], index: 0, kind: input, shape index: {}]   ;;  %s2063_s1 = inlined_call_operand.hbm [shape: f32[16,8,256], index: 1, kind: input, shape index: {}]   ;;  %s2064_s2 = inlined_call_operand.vmem [shape: bf16[64,136], index: 2, kind: input, shape index: {}]   ;;  %s2065_s3 = inlined_call_operand.vmem [shape: f32[64,1], index: 3, kind: input, shape index: {}]   ;;  %s2066_s4 = inlined_call_operand.vmem [shape: f32[32,8], index: 4, kind: input, shape index: {}]   ;;  %s2067_s5 = inlined_call_operand.vmem [shape: f32[32,1], index: 5, kind: input, shape index: {}]   ;;  %s2068_s6 = inlined_call_operand.vmem [shape: f32[32,32], index: 6, kind: input, shape index: {}]   ;;  %s2069_s7 = inlined_call_operand.vmem [shape: f32[32,1], index: 7, kind: input, shape index: {}]   ;;  %s2070_s8 = inlined_call_operand.vmem [shape: f32[32,1], index: 8, kind: input, shape index: {}]   ;;  %s2071_s9 = inlined_call_operand.hbm [shape: f32[2,32,256], index: 9, kind: output, shape index: {}]  }
   0x1   :  { %15 = vsyncpa [#allocation5], 0 }
   0x2   :  { %17 = vsyncpa [#allocation5 + $0x1], 0  ;;  %s1638_s30 = smov 0   ;;  %s1640_s10 = smov 0  }
   0x3   :  { %s1642_s11 = smov 0   ;;  %s1644_s12 = smov 0  }
   0x4 LB: > { %s1659_s13 = sadd.s32 4294967295, %s1566_s12   ;;  %s1284_s14 = sadd.s32 4294967294, %s1566_s12   ;;  %s1566_s12 = sphi %s1644_s12, %s2087_s12   ;;  %s1562_s11 = sphi %s1642_s11, %s2086_s11   ;;  %s1558_s10 = sphi %s1640_s10, %s2085_s10   ;;  %s1554_s30 = sphi %s1638_s30, %s2084_s30  }
   0x5   : > { %s1663_s15 = sadd.s32 1, %s1566_s12   ;;  %s224_s16 = sadd.s32 1, %s1562_s11 }
   0x6   : > { %s221_s17 = ssub.s32 %s1566_s12, %s1663_s15  ;;  %p234_p0 = scmp.ne.s32.totalorder %s1562_s11, %s1558_s10 }
   0x7   : > { %p222_p1 = scmp.eq.s32.totalorder %s221_s17, 0  ;;  %p235_p2 = scmp.eq.s32.totalorder %s1659_s13, 1 }
   0x8   : > { %p240_p3 = scmp.ne.s32.totalorder %s1558_s10, %s1554_s30  ;;  %p241_p4 = scmp.eq.s32.totalorder %s1284_s14, 1 }
   0x9   : > { %s1674_s18 = scalar_select %p222_p1, %s1562_s11, %s224_s16  }
   0xa   : > { %p1676_p5 = por %p235_p2, %p234_p0  ;;  %p1680_p6 = por %p241_p4, %p240_p3 }
   0xb   : > { %p1285_p7 = scmp.ge.s32.totalorder %s1566_s12, 1  ;;  %p248_p8 = scmp.lt.s32.totalorder %s1566_s12, 3 }
   0xc   : > { %s2075_s19 = scalar_select %p1676_p5, 1, 0 }
   0xd   : > { %s2076_s20 = scalar_select %p1680_p6, 1, 0 }
   0xe   : > { %p2072_p9 = scmp.eq.s32.totalorder %s1659_s13, 0  ;;  %p1687_p10 = pnand %p1285_p7, %p248_p8 }
   0xf   : > { %s1568_s22 = smov [#allocation3]   ;;  %s1472_s27 = scalar_lea.hbm %s2063_s1, 4096 }
  0x10   : > { %s2077_s21 = scalar_select %p1687_p10, 1, 0 }
  0x11   : > { %s260_s23 = sshll.u32 %s1568_s22, 4  ;;  %p1388_p11 = pneg %p1687_p10  ;;  %s261_s23 = int_to_ptr.vmem [resolvable:$true] %s260_s23 }
  0x12   : > { %p1473_p13 = scmp.ne.s32.totalorder %s2063_s1, %s1472_s27  ;;  %p1479_p3 = scmp.lt.u32.totalorder %s1472_s27, %s2063_s1 }
  0x13   : > { %p1695_p12 = pnand %p2072_p9, %p1388_p11 }
  0x15   : > { %p1474_p0 = pneg %p1695_p12 }
  0x17   : > { %p1475_p1 = pnand %p1474_p0, %p1473_p13 }
  0x19   : > { %p1476_p2 = pneg %p1475_p1 }
  0x1b   : > { %p1481_p4 = pnand %p1479_p3, %p1476_p2 }
  0x1d   : > { %1484 = shalt.err (!%p1481_p4)
}
  0x1e   : > { %s1485_s17 = scalar_lea.vmem %s261_s23, 4096  ;;  %p1493_p9 = scmp.lt.s32.totalorder %s261_s23, %s261_s23 }
  0x1f   : > { %p1486_p7 = scmp.ne.s32.totalorder %s261_s23, %s1485_s17  ;;  %p1494_p6 = scmp.lt.s32.totalorder %s1485_s17, %s1485_s17 }
  0x21   : > { %p1488_p8 = pnand %p1486_p7, %p1474_p0  ;;  %p1495_p5 = por %p1494_p6, %p1493_p9 }
  0x23   : > { %p1489_p11 = pneg %p1488_p8 }
  0x25   : > { %p1496_p10 = pnand %p1495_p5, %p1489_p11 }
  0x27   : > { %1499 = shalt.err (!%p1496_p10)
}
  0x28   : > { %s1569_s22 = smov 256   ;;  %s1570_s25 = smov 16  }
  0x29   : > { %1391 = dma.hbm_to_vmem [thread:$0]  (!%p1695_p12), %s2063_s1, 4096, %s261_s23, [#allocation4], %s1569_s22, %s1569_s22, %s1570_s25  }
  0x2a   : > { %p2079_p13 = scmp.ne.s32.totalorder %s2077_s21, 0 }
  0x2b   : > { %p2080_p1 = scmp.eq.s32.totalorder (!%p2079_p13), %s1659_s13, 0 }
  0x2c   : > { %305 = sbr.rel (%p2079_p13) target bundleno = 1067 (0x42b), region = 56 }
  0x33   : > { %1545 = dma.done.wait (%p2080_p1), [#allocation4], 4096   ;;  %p2081_p0 = pmov %p2080_p1 }
  0x34   : > { %p341_p5 = scmp.lt.s32.totalorder %s1659_s13, 1  ;;  %s1571_s23 = smov 96   ;;  %v1454_v2 = vld [vmem:[%s2064_s2 + $0x34] ss:$8 sps:$4 sm:$0xff]   ;;  %vm699_vm0 = vcmask 64512   ;;  %v355_v4 = vlaneseq  ;;  %v360_v8 = vld [vmem:[#allocation3] sm:$0xff] }
  0x35   : > { %1547 = vsyncadd (%p2081_p0), [#allocation4], 4294963200  ;;  %s1572_s21 = smov 102   ;;  %s1573_s17 = smov 90   ;;  %1305 = vmatprep.mubr.msk.bf16.mxu1 %vm699_vm0, %v1454_v2  ;;  %v361_v9 = vld [vmem:[#allocation3 + $0x8] sm:$0xff]  ;;  %v374_v12 = vld [vmem:[#allocation3 + $0x10] sm:$0xff] }
  0x36   : > { %s342_s27 = scalar_select %p341_p5, %s1659_s13, 1  ;;  %v1762_v5 = vand.u32 127, %v355_v4  ;;  %v375_v13 = vld [vmem:[#allocation3 + $0x18] sm:$0xff]  ;;  %v388_v20 = vld [vmem:[#allocation3 + $0x20] sm:$0xff]  ;;  %v389_v21 = vld [vmem:[#allocation3 + $0x28] sm:$0xff]  ;;  %vm712_vm14 = vcmask 1043456  }
  0x37   : > { %s1574_s22 = smov 6   ;;  %s1575_s25 = smov 122   ;;  %v402_v36 = vld [vmem:[#allocation3 + $0x30] sm:$0xff]  ;;  %v403_v37 = vld [vmem:[#allocation3 + $0x38] sm:$0xff]  ;;  %v416_v40 = vld [vmem:[#allocation3 + $0x40] sm:$0xff]  ;;  %vm910_vm15 = vcmask 261120  }
  0x38   : > { %s1319_s29 = sshll.u32 %s342_s27, 4  ;;  %s1576_s26 = smov 38   ;;  %vm370_vm1 = vcmp.lt.s32.totalorder %v1762_v5, 96  ;;  %vm357_vm2 = vcmp.lt.s32.totalorder %v1762_v5, 102  ;;  %vm384_vm3 = vcmp.lt.s32.totalorder %v1762_v5, 90  ;;  %vm398_vm4 = vcmp.lt.s32.totalorder %v1762_v5, 6 }
  0x39   : > { %s345_s16 = scalar_lea.vmem %s2062_s0, %s1319_s29  ;;  %s1577_s28 = smov 32   ;;  %vm412_vm5 = vcmp.lt.s32.totalorder %v1762_v5, 122  ;;  %v417_v41 = vld [vmem:[#allocation3 + $0x48] sm:$0xff]  ;;  %vm426_vm6 = vcmp.lt.s32.totalorder %v1762_v5, 38  ;;  %v430_v54 = vld [vmem:[#allocation3 + $0x50] sm:$0xff]  ;;  %vm440_vm7 = vcmp.lt.s32.totalorder %v1762_v5, 32 }
  0x3a   : > { %v1726_v0 = vld [vmem:[%s345_s16] sm:$0xff]  ;;  %v1730_v1 = vld [vmem:[%s345_s16 + $0x8] sm:$0xff]  ;;  %s1578_s27 = smov 26   ;;  %s1579_s29 = smov 76   ;;  %v431_v55 = vld [vmem:[#allocation3 + $0x58] sm:$0xff]  ;;  %vm454_vm8 = vcmp.lt.s32.totalorder %v1762_v5, 26 }
  0x3b   : > { %366 = vrot.lane.b32.xlu1 %v1726_v0, %s1571_s23  ;;  %351 = vrot.lane.b32.xlu0 %v1726_v0, %s1572_s21  ;;  %s1580_s14 = smov 64   ;;  %s1581_s24 = smov 52   ;;  %v792_v3 = vadd.f32 %v1730_v1, %v1726_v0  ;;  %v444_v58 = vld [vmem:[#allocation3 + $0x60] sm:$0xff]  ;;  %v445_v59 = vld [vmem:[#allocation3 + $0x68] sm:$0xff]  ;;  %vm468_vm9 = vcmp.lt.s32.totalorder %v1762_v5, 76  ;;  %vm482_vm10 = vcmp.lt.s32.totalorder %v1762_v5, 64 }
  0x3c   : > { %s1582_s16 = smov 12   ;;  %vm496_vm11 = vcmp.lt.s32.totalorder %v1762_v5, 52  ;;  %vm510_vm12 = vcmp.lt.s32.totalorder %v1762_v5, 12  ;;  %vm524_vm13 = vcmp.lt.s32.totalorder %v1762_v5, 116  ;;  %v550_v5 = vld [vmem:[#allocation3 + $0xf8] sm:$0xff]  ;;  %p2082_p9 = scmp.ne.s32.totalorder %s2075_s19, 0 }
  0x3f   : > { %368 = vrot.lane.b32.xlu1 %v1730_v1, %s1571_s23  ;;  %353 = vrot.lane.b32.xlu0 %v1730_v1, %s1572_s21  ;;  %s1583_s23 = smov 116   ;;  %s338_s21 = sand.u32 1, %s1558_s10  }
  0x43   : > { %382 = vrot.lane.b32.xlu1 %v1730_v1, %s1573_s17  ;;  %380 = vrot.lane.b32.xlu0 %v1726_v0, %s1573_s17  ;;  %s1290_s17 = sshll.u32 %s338_s21, 6 }
  0x47   : > { %396 = vrot.lane.b32.xlu1 %v1730_v1, %s1574_s22  ;;  %394 = vrot.lane.b32.xlu0 %v1726_v0, %s1574_s22  ;;  %s1984_s22 = scalar_lea.vmem [#allocation6], %s1290_s17 }
  0x4b   : > { %410 = vrot.lane.b32.xlu1 %v1730_v1, %s1575_s25  ;;  %408 = vrot.lane.b32.xlu0 %v1726_v0, %s1575_s25  ;;  %s1320_s25 = sshll.u32 %s1659_s13, 10  ;;  %s2021_s13 = scalar_lea.sflag [#allocation5], %s338_s21 }
  0x4f   : > { %424 = vrot.lane.b32.xlu1 %v1730_v1, %s1576_s26  ;;  %422 = vrot.lane.b32.xlu0 %v1726_v0, %s1576_s26  ;;  %s1210_s26 = sshll.u32 %s1984_s22, 4  ;;  %s2015_s26 = int_to_ptr.vmem [resolvable:$true] %s1210_s26 }
  0x53   : > { %438 = vrot.lane.b32.xlu1 %v1730_v1, %s1577_s28  ;;  %436 = vrot.lane.b32.xlu0 %v1726_v0, %s1577_s28 }
  0x57   : > { %452 = vrot.lane.b32.xlu1 %v1730_v1, %s1578_s27  ;;  %450 = vrot.lane.b32.xlu0 %v1726_v0, %s1578_s27 }
  0x5b   : > { %466 = vrot.lane.b32.xlu1 %v1730_v1, %s1579_s29  ;;  %464 = vrot.lane.b32.xlu0 %v1726_v0, %s1579_s29  ;;  %s2013_s29 = scalar_lea.hbm %s2071_s9, %s1320_s25 }
  0x5f   : > { %480 = vrot.lane.b32.xlu1 %v1730_v1, %s1580_s14  ;;  %478 = vrot.lane.b32.xlu0 %v1726_v0, %s1580_s14  ;;  %s1500_s14 = scalar_lea.vmem %s2015_s26, 1024 }
  0x60   : > { %p1501_p6 = scmp.ne.s32.totalorder %s2015_s26, %s1500_s14 }
  0x62   : > { %p1502_p10 = pnand %p1501_p6, %p2082_p9 }
  0x63   : > { %494 = vrot.lane.b32.xlu1 %v1730_v1, %s1581_s24  ;;  %492 = vrot.lane.b32.xlu0 %v1726_v0, %s1581_s24  ;;  %s1585_s24 = smov [#allocation6]  }
  0x64   : > { %p1503_p12 = pneg %p1502_p10 }
  0x67   : > { %508 = vrot.lane.b32.xlu1 %v1730_v1, %s1582_s16  ;;  %506 = vrot.lane.b32.xlu0 %v1726_v0, %s1582_s16  ;;  %s1504_s16 = sshll.u32 %s1585_s24, 4  ;;  %s1505_s16 = int_to_ptr.vmem [resolvable:$false] %s1504_s16 }
  0x68   : > { %p1507_p2 = scmp.lt.s32.totalorder %s2015_s26, %s1505_s16 }
  0x6b   : > { %522 = vrot.lane.b32.xlu1 %v1730_v1, %s1583_s23  ;;  %520 = vrot.lane.b32.xlu0 %v1726_v0, %s1583_s23  ;;  %s1506_s23 = scalar_lea.vmem %s1505_s16, 2048 }
  0x6c   : > { %p1508_p3 = scmp.lt.s32.totalorder %s1506_s23, %s1500_s14 }
  0x6e   : > { %p1509_p4 = por %p1508_p3, %p1507_p2 }
  0x70   : > { %p1510_p7 = pnand %p1509_p4, %p1503_p12 }
  0x8a   : > { %793 = vadd.xlane.f32.xlu0 %v792_v3 }
  0xad   : > { %v367_v6 = vpop.permute.xlu1 %366  ;;  %v352_v7 = vpop.permute.xlu0 %351 }
  0xb1   : > { %v369_v10 = vpop.permute.xlu1 %368  ;;  %v354_v11 = vpop.permute.xlu0 %353 }
  0xb2   : > { %v371_v14 = vsel %vm370_vm1, %v367_v6, %v369_v10  ;;  %v372_v15 = vsel %vm370_vm1, %v369_v10, %v367_v6  ;;  %v358_v16 = vsel %vm357_vm2, %v352_v7, %v354_v11  ;;  %v359_v17 = vsel %vm357_vm2, %v354_v11, %v352_v7  ;;  %v459_v10 = vld [vmem:[#allocation3 + $0x78] sm:$0xff] }
  0xb3   : > { %v362_v18 = vmul.f32 %v360_v8, %v359_v17  ;;  %v363_v19 = vmul.f32 %v361_v9, %v358_v16  ;;  %v376_v22 = vmul.f32 %v374_v12, %v372_v15  ;;  %v377_v23 = vmul.f32 %v375_v13, %v371_v14  ;;  %v458_v9 = vld [vmem:[#allocation3 + $0x70] sm:$0xff]  ;;  %v472_v13 = vld [vmem:[#allocation3 + $0x80] sm:$0xff]  ;;  %v473_v14 = vld [vmem:[#allocation3 + $0x88] sm:$0xff] }
  0xb5   : > { %v383_v24 = vpop.permute.xlu1 %382  ;;  %v381_v25 = vpop.permute.xlu0 %380  ;;  %v590_v26 = vpack.c.bf16 %v363_v19, %v1730_v1  ;;  %v589_v27 = vpack.c.bf16 %v362_v18, %v1726_v0 }
  0xb6   : > { %v385_v28 = vsel %vm384_vm3, %v381_v25, %v383_v24  ;;  %v386_v29 = vsel %vm384_vm3, %v383_v24, %v381_v25 }
  0xb7   : > { %v390_v30 = vmul.f32 %v388_v20, %v386_v29  ;;  %v391_v31 = vmul.f32 %v389_v21, %v385_v28  ;;  %719 = vmatprep.subr.bf16.mxu0 %v590_v26  ;;  %1364 = vmatprep.subr.bf16.mxu1 %v590_v26  ;;  %v487_v28 = vld [vmem:[#allocation3 + $0x98] sm:$0xff] }
  0xb8   : > { %720 = vmatpush1.bf16.msra.mxu0 %v589_v27  ;;  %1373 = vmatpush1.bf16.msra.mxu1 %v589_v27  ;;  %v486_v27 = vld [vmem:[#allocation3 + $0x90] sm:$0xff] }
  0xb9   : > { %v397_v32 = vpop.permute.xlu1 %396  ;;  %v395_v33 = vpop.permute.xlu0 %394  ;;  %v592_v34 = vpack.c.bf16 %v391_v31, %v377_v23  ;;  %v591_v35 = vpack.c.bf16 %v390_v30, %v376_v22  ;;  %v500_v31 = vld [vmem:[#allocation3 + $0xa0] sm:$0xff] }
  0xba   : > { %v399_v38 = vsel %vm398_vm4, %v395_v33, %v397_v32  ;;  %v400_v39 = vsel %vm398_vm4, %v397_v32, %v395_v33  ;;  %v501_v32 = vld [vmem:[#allocation3 + $0xa8] sm:$0xff] }
  0xbb   : > { %721 = vmatprep.subr.bf16.mxu0 %v592_v34  ;;  %1365 = vmatprep.subr.bf16.mxu1 %v592_v34  ;;  %v404_v46 = vmul.f32 %v402_v36, %v400_v39  ;;  %v405_v47 = vmul.f32 %v403_v37, %v399_v38 }
  0xbc   : > { %722 = vmatpush1.bf16.msra.mxu0 %v591_v35  ;;  %1374 = vmatpush1.bf16.msra.mxu1 %v591_v35 }
  0xbd   : > { %v411_v42 = vpop.permute.xlu1 %410  ;;  %v409_v43 = vpop.permute.xlu0 %408 }
  0xbe   : > { %v413_v44 = vsel %vm412_vm5, %v409_v43, %v411_v42  ;;  %v414_v45 = vsel %vm412_vm5, %v411_v42, %v409_v43 }
  0xbf   : > { %v418_v48 = vmul.f32 %v416_v40, %v413_v44  ;;  %v419_v49 = vmul.f32 %v417_v41, %v414_v45  ;;  %v543_v45 = vld [vmem:[#allocation3 + $0xe8] sm:$0xff] }
  0xc1   : > { %v425_v50 = vpop.permute.xlu1 %424  ;;  %v423_v51 = vpop.permute.xlu0 %422  ;;  %v594_v52 = vpack.c.bf16 %v419_v49, %v405_v47  ;;  %v593_v53 = vpack.c.bf16 %v418_v48, %v404_v46  ;;  %v514_v46 = vld [vmem:[#allocation3 + $0xb0] sm:$0xff]  ;;  %v515_v47 = vld [vmem:[#allocation3 + $0xb8] sm:$0xff] }
  0xc2   : > { %v427_v56 = vsel %vm426_vm6, %v423_v51, %v425_v50  ;;  %v428_v57 = vsel %vm426_vm6, %v425_v50, %v423_v51  ;;  %v528_v50 = vld [vmem:[#allocation3 + $0xc0] sm:$0xff]  ;;  %v529_v51 = vld [vmem:[#allocation3 + $0xc8] sm:$0xff] }
  0xc3   : > { %723 = vmatprep.subr.bf16.mxu0 %v594_v52  ;;  %1366 = vmatprep.subr.bf16.mxu1 %v594_v52  ;;  %v432_v0 = vmul.f32 %v430_v54, %v427_v56  ;;  %v433_v1 = vmul.f32 %v431_v55, %v428_v57  ;;  %v536_v54 = vld [vmem:[#allocation3 + $0xd8] sm:$0xff] }
  0xc4   : > { %724 = vmatpush1.bf16.msra.mxu0 %v593_v53  ;;  %1375 = vmatpush1.bf16.msra.mxu1 %v593_v53 }
  0xc5   : > { %v439_v60 = vpop.permute.xlu1 %438  ;;  %v437_v61 = vpop.permute.xlu0 %436 }
  0xc6   : > { %v441_v62 = vsel %vm440_vm7, %v437_v61, %v439_v60  ;;  %v442_v63 = vsel %vm440_vm7, %v439_v60, %v437_v61 }
  0xc7   : > { %v446_v2 = vmul.f32 %v444_v58, %v441_v62  ;;  %v447_v3 = vmul.f32 %v445_v59, %v442_v63  ;;  %v542_v58 = vld [vmem:[#allocation3 + $0xe0] sm:$0xff]  ;;  %v549_v63 = vld [vmem:[#allocation3 + $0xf0] sm:$0xff] }
  0xc9   : > { %v453_v4 = vpop.permute.xlu1 %452  ;;  %v451_v6 = vpop.permute.xlu0 %450  ;;  %v596_v7 = vpack.c.bf16 %v447_v3, %v433_v1  ;;  %v595_v8 = vpack.c.bf16 %v446_v2, %v432_v0  ;;  %v535_v0 = vld [vmem:[#allocation3 + $0xd0] sm:$0xff] }
  0xca   : > { %v455_v11 = vsel %vm454_vm8, %v451_v6, %v453_v4  ;;  %v456_v12 = vsel %vm454_vm8, %v453_v4, %v451_v6 }
  0xcb   : > { %725 = vmatprep.subr.bf16.mxu0 %v596_v7  ;;  %1367 = vmatprep.subr.bf16.mxu1 %v596_v7  ;;  %v460_v19 = vmul.f32 %v458_v9, %v455_v11  ;;  %v461_v20 = vmul.f32 %v459_v10, %v456_v12 }
  0xcc   : > { %726 = vmatpush1.bf16.msra.mxu0 %v595_v8  ;;  %1376 = vmatpush1.bf16.msra.mxu1 %v595_v8 }
  0xcd   : > { %v467_v15 = vpop.permute.xlu1 %466  ;;  %v465_v16 = vpop.permute.xlu0 %464 }
  0xce   : > { %v469_v17 = vsel %vm468_vm9, %v465_v16, %v467_v15  ;;  %v1775_v18 = vsel %vm468_vm9, %v467_v15, %v465_v16  ;;  %v797_v15 = vld [vmem:[%s2066_s4] sm:$0xff] }
  0xcf   : > { %v474_v21 = vmul.f32 %v472_v13, %v469_v17  ;;  %v475_v22 = vmul.f32 %v473_v14, %v1775_v18  ;;  %v538_v1 = vmul.f32 %v536_v54, %v469_v17  ;;  %v537_v9 = vmul.f32 %v535_v0, %v1775_v18  ;;  %v1452_v14 = vld [vmem:[%s2064_s2 + $0x30] ss:$8 sps:$4 sm:$0xff]   ;;  %v798_v18 = vld [vmem:[%s2066_s4 + $0x8] sm:$0xff] }
  0xd1   : > { %v481_v23 = vpop.permute.xlu1 %480  ;;  %v479_v24 = vpop.permute.xlu0 %478  ;;  %v598_v25 = vpack.c.bf16 %v475_v22, %v461_v20  ;;  %v597_v26 = vpack.c.bf16 %v474_v21, %v460_v19  ;;  %v799_v19 = vld [vmem:[%s2066_s4 + $0x10] sm:$0xff]  ;;  %v800_v20 = vld [vmem:[%s2066_s4 + $0x18] sm:$0xff]  ;;  %v906_v21 = vld [vmem:[%s2068_s6] sm:$0xff] }
  0xd2   : > { %v483_v29 = vsel %vm482_vm10, %v479_v24, %v481_v23  ;;  %v484_v30 = vsel %vm482_vm10, %v481_v23, %v479_v24  ;;  %v1455_v22 = vld [vmem:[%s2064_s2] ss:$8 sps:$4 sm:$0xff]   ;;  %v1457_v23 = vld [vmem:[%s2064_s2 + $0x4] ss:$8 sps:$4 sm:$0xff]   ;;  %v1458_v24 = vld [vmem:[%s2064_s2 + $0x14] ss:$8 sps:$4 sm:$0xff]  }
  0xd3   : > { %727 = vmatprep.subr.bf16.mxu0 %v598_v25  ;;  %1368 = vmatprep.subr.bf16.mxu1 %v598_v25  ;;  %v488_v37 = vmul.f32 %v486_v27, %v483_v29  ;;  %v489_v38 = vmul.f32 %v487_v28, %v484_v30  ;;  %v545_v55 = vmul.f32 %v543_v45, %v483_v29  ;;  %v615_v25 = vld [vmem:[%s2065_s3] sm:$0xff]  ;;  %v616_v27 = vld [vmem:[%s2065_s3 + $0x8] sm:$0xff]  ;;  %v1460_v28 = vld [vmem:[%s2064_s2 + $0x10] ss:$8 sps:$4 sm:$0xff]  }
  0xd4   : > { %728 = vmatpush1.bf16.msra.mxu0 %v597_v26  ;;  %1377 = vmatpush1.bf16.msra.mxu1 %v597_v26  ;;  %v544_v4 = vmul.f32 %v542_v58, %v484_v30  ;;  %v1584_v26 = vmov 0   ;;  %v1461_v29 = vld [vmem:[%s2064_s2 + $0x24] ss:$8 sps:$4 sm:$0xff]   ;;  %v617_v30 = vld [vmem:[%s2065_s3 + $0x10] sm:$0xff] }
  0xd5   : > { %v495_v33 = vpop.permute.xlu1 %494  ;;  %v493_v34 = vpop.permute.xlu0 %492  ;;  %v604_v8 = vpack.c.bf16 %v545_v55, %v538_v1  ;;  %1302 = vmatprep.mubr.msk.bf16.mxu0 %vm699_vm0, %v1457_v23  ;;  %1450 = vset.pattern.permute.xlu1 %v1584_v26  ;;  %v803_v45 = vld [vmem:[%s2067_s5 + $0x10] sm:$0xff]  ;;  %v907_v55 = vld [vmem:[%s2068_s6 + $0x8] sm:$0xff]  ;;  %v1108_v58 = vld [vmem:[%s2069_s7] sm:$0xff] }
  0xd6   : > { %v497_v35 = vsel %vm496_vm11, %v493_v34, %v495_v33  ;;  %v498_v36 = vsel %vm496_vm11, %v495_v33, %v493_v34  ;;  %v603_v10 = vpack.c.bf16 %v544_v4, %v537_v9  ;;  %625 = vperm.xlu1 %1450, %v615_v25   ;;  %1451 = vset.pattern.permute.xlu0 %v1584_v26  ;;  %v620_v1 = vld [vmem:[%s2065_s3 + $0x28] sm:$0xff] }
  0xd7   : > { %v502_v39 = vmul.f32 %v500_v31, %v497_v35  ;;  %v503_v40 = vmul.f32 %v501_v32, %v498_v36  ;;  %v551_v6 = vmul.f32 %v549_v63, %v498_v36  ;;  %v552_v7 = vmul.f32 %v550_v5, %v497_v35  ;;  %v618_v31 = vld [vmem:[%s2065_s3 + $0x18] sm:$0xff]  ;;  %v1463_v32 = vld [vmem:[%s2064_s2 + $0x20] ss:$8 sps:$4 sm:$0xff]   ;;  %1114 = vperm.xlu0 %1451, %v1108_v58  }
  0xd8   : > { %v1109_v9 = vld [vmem:[%s2069_s7 + $0x8] sm:$0xff] }
  0xd9   : > { %v509_v41 = vpop.permute.xlu1 %508  ;;  %v507_v42 = vpop.permute.xlu0 %506  ;;  %v600_v43 = vpack.c.bf16 %v503_v40, %v489_v38  ;;  %v599_v44 = vpack.c.bf16 %v502_v39, %v488_v37  ;;  %v605_v11 = vpack.c.bf16 %v551_v6, %v551_v6  ;;  %v606_v12 = vpack.c.bf16 %v552_v7, %v552_v7  ;;  %v802_v37 = vld [vmem:[%s2067_s5 + $0x8] sm:$0xff]  ;;  %v801_v38 = vld [vmem:[%s2067_s5] sm:$0xff] }
  0xda   : > { %v511_v48 = vsel %vm510_vm12, %v507_v42, %v509_v41  ;;  %v512_v49 = vsel %vm510_vm12, %v509_v41, %v507_v42  ;;  %630 = vperm.xlu1 %1450, %v616_v27  }
  0xdb   : > { %729 = vmatprep.subr.bf16.mxu0 %v600_v43  ;;  %1369 = vmatprep.subr.bf16.mxu1 %v600_v43  ;;  %v516_v59 = vmul.f32 %v514_v46, %v512_v49  ;;  %v517_v60 = vmul.f32 %v515_v47, %v511_v48  ;;  %v714_v13 = vsel %vm712_vm14, %v605_v11, 0  ;;  %v804_v43 = vld [vmem:[%s2067_s5 + $0x18] sm:$0xff] }
  0xdc   : > { %730 = vmatpush1.bf16.msra.mxu0 %v599_v44  ;;  %1378 = vmatpush1.bf16.msra.mxu1 %v599_v44  ;;  %v1111_v11 = vld [vmem:[%s2069_s7 + $0x18] sm:$0xff] }
  0xdd   : > { %v523_v52 = vpop.permute.xlu1 %522  ;;  %v521_v53 = vpop.permute.xlu0 %520 }
  0xde   : > { %v525_v56 = vsel %vm524_vm13, %v521_v53, %v523_v52  ;;  %v526_v57 = vsel %vm524_vm13, %v523_v52, %v521_v53  ;;  %635 = vperm.xlu1 %1450, %v617_v30  }
  0xdf   : > { %v530_v61 = vmul.f32 %v528_v50, %v525_v56  ;;  %v531_v62 = vmul.f32 %v529_v51, %v526_v57  ;;  %v908_v56 = vld [vmem:[%s2068_s6 + $0x10] sm:$0xff]  ;;  %v909_v57 = vld [vmem:[%s2068_s6 + $0x18] sm:$0xff] }
  0xe1   : > { %v602_v2 = vpack.c.bf16 %v531_v62, %v517_v60  ;;  %v601_v3 = vpack.c.bf16 %v530_v61, %v516_v59  ;;  %v1143_v61 = vld [vmem:[%s2070_s8 + $0x18] sm:$0xff] }
  0xe2   : > { %640 = vperm.xlu1 %1450, %v618_v31   ;;  %1161 = vperm.xlu0 %1451, %v1143_v61  }
  0xe3   : > { %731 = vmatprep.subr.bf16.mxu0 %v602_v2  ;;  %1370 = vmatprep.subr.bf16.mxu1 %v602_v2 }
  0xe4   : > { %732 = vmatpush1.bf16.msra.mxu0 %v601_v3  ;;  %1379 = vmatpush1.bf16.msra.mxu1 %v601_v3 }
  0xe5   : > { %733 = vmatprep.subr.bf16.mxu0 %v604_v8  ;;  %1371 = vmatprep.subr.bf16.mxu1 %v604_v8 }
  0xe6   : > { %650 = vperm.xlu0 %1451, %v620_v1  }
  0xe8   : > { %734 = vmatpush1.bf16.msra.mxu0 %v603_v10  ;;  %1380 = vmatpush1.bf16.msra.mxu1 %v603_v10  ;;  %v1110_v10 = vld [vmem:[%s2069_s7 + $0x10] sm:$0xff] }
  0xe9   : > { %1301 = vmatprep.subr.msk.bf16.mxu0 %vm712_vm14, %v606_v12  ;;  %1372 = vmatprep.subr.msk.bf16.mxu1 %vm712_vm14, %v606_v12  ;;  %v1140_v12 = vld [vmem:[%s2070_s8] sm:$0xff] }
  0xec   : > { %736 = vmatpush1.bf16.msra.mxu0 %v714_v13  ;;  %1381 = vmatpush1.bf16.msra.mxu1 %v714_v13  ;;  %v1141_v13 = vld [vmem:[%s2070_s8 + $0x8] sm:$0xff] }
  0xef   : > { %782 = vmatmul.mubr.bf16.vlgmr.msra.gmra.mrb[0].mxu1 %v1452_v14  ;;  %752 = vmatmul.mubr.bf16.vlgmr.msra.gmra.mrb[0].mxu0 %v1455_v22  ;;  %v1142_v14 = vld [vmem:[%s2070_s8 + $0x10] sm:$0xff] }
  0xf0   : > { %1336 = vmatprep.mubr.msk.f32.mxu1 %vm699_vm0, %v797_v15  ;;  %1303 = vmatprep.mubr.msk.bf16.mxu0 %vm699_vm0, %v1458_v24 }
  0xf7   : > { %762 = vmatmul.mubr.bf16.gmra.mrb[4].mxu0 %v1460_v28 }
  0xf8   : > { %1304 = vmatprep.mubr.msk.bf16.mxu0 %vm699_vm0, %v1461_v29 }
  0xff   : > { %772 = vmatmul.mubr.bf16.gmra.mrb[8].mxu0 %v1463_v32 }
 0x117   : > { %v794_v16 = vpop.xlane.xlu0 %793 }
 0x118   : > { %v796_v17 = vmul.f32 0.00390625, %v794_v16 }
 0x11a   : > { %1334 = vmatprep.subr.mxu1 %v796_v17 }
 0x11b   : > { %1335 = vmatpush3.msra.mxu1 %v796_v17  ;;  %v619_v17 = vld [vmem:[%s2065_s3 + $0x20] sm:$0xff] }
 0x11c   : > { %1337 = vmatmul.mubr.msk.f32.vlgmr.msra.gmra.mrb[4].mxu1 %vm699_vm0, %v798_v18 }
 0x11d   : > { %1339 = vmatprep.mubr.msk.f32.mxu1 %vm699_vm0, %v799_v19 }
 0x120   : > { %1340 = vmatmul.mubr.msk.f32.gmra.mrb[6].mxu1 %vm699_vm0, %v800_v20 }
 0x121   : > { %1350 = vmatprep.mubr.msk.f32.mxu1 %vm910_vm15, %v906_v21 }
 0x155   : > { %v626_v20 = vpop.permute.xlu1 %625 }
 0x159   : > { %v631_v21 = vpop.permute.xlu1 %630 }
 0x15d   : > { %v636_v22 = vpop.permute.xlu1 %635 }
 0x161   : > { %v641_v23 = vpop.permute.xlu1 %640 }
 0x1c2   : > { %v1839_v33 = vpop.f32.mrb[0].mxu1  ;;  %v753_v59 = vpop.f32.mrb[0].mxu0 }
 0x1c3   : > { %v1841_v34 = vpop.f32.mrb[1].mxu1  ;;  %v755_v60 = vpop.f32.mrb[1].mxu0  ;;  %v754_v29 = vadd.f32 %v753_v59, %v626_v20 }
 0x1c4   : > { %v1843_v35 = vpop.f32.mrb[2].mxu1  ;;  %v757_v62 = vpop.f32.mrb[2].mxu0  ;;  %v756_v30 = vadd.f32 %v755_v60, %v626_v20 }
 0x1c5   : > { %v1845_v36 = vpop.f32.mrb[3].mxu1  ;;  %v759_v63 = vpop.f32.mrb[3].mxu0  ;;  %v758_v24 = vadd.f32 %v757_v62, %v631_v21 }
 0x1c6   : > { %v760_v25 = vadd.f32 %v759_v63, %v631_v21 }
 0x1ca   : > { %v1877_v5 = vpop.f32.mrb[4].mxu0 }
 0x1cb   : > { %v1879_v0 = vpop.f32.mrb[5].mxu0 }
 0x1cc   : > { %v767_v2 = vpop.f32.mrb[6].mxu0 }
 0x1cd   : > { %v769_v3 = vpop.f32.mrb[7].mxu0 }
 0x1d2   : > { %v1902_v15 = vpop.f32.mrb[8].mxu0 }
 0x1d3   : > { %v1904_v16 = vpop.f32.mrb[9].mxu0 }
 0x1d4   : > { %v1909_v18 = vpop.f32.mrb[10].mxu0 }
 0x1d5   : > { %v1911_v19 = vpop.f32.mrb[11].mxu0 }
 0x1ef   : > { %v1338_v39 = vpop.f32.mrb[4].mxu1 }
 0x1f0   : > { %v889_v40 = vadd.f32 %v1338_v39, %v802_v37  ;;  %v883_v41 = vpop.f32.mrb[5].mxu1 }
 0x1f1   : > { %v884_v42 = vadd.f32 %v883_v41, %v801_v38 }
 0x1f2   : > { %v903_v44 = vmax.f32 %v889_v40, 0.0 }
 0x1f3   : > { %v902_v46 = vmax.f32 %v884_v42, 0.0  ;;  %v1341_v47 = vpop.f32.mrb[6].mxu1 }
 0x1f4   : > { %v899_v48 = vadd.f32 %v1341_v47, %v804_v43  ;;  %v893_v49 = vpop.f32.mrb[7].mxu1  ;;  %v768_v47 = vadd.f32 %v767_v2, %v641_v23 }
 0x1f5   : > { %v1356_v50 = vpack.c.bf16 %v903_v44, %v902_v46  ;;  %v894_v51 = vadd.f32 %v893_v49, %v803_v45 }
 0x1f6   : > { %v905_v52 = vmax.f32 %v899_v48, 0.0  ;;  %v770_v48 = vadd.f32 %v769_v3, %v641_v23 }
 0x1f7   : > { %v904_v53 = vmax.f32 %v894_v51, 0.0  ;;  %1357 = vmatprep.subr.bf16.mxu1 %v1356_v50 }
 0x1f8   : > { %1359 = vmatpush3.bf16.msra.mxu1 %v1356_v50 }
 0x1f9   : > { %v1360_v54 = vpack.c.bf16 %v905_v52, %v904_v53  ;;  %v764_v52 = vadd.f32 %v1877_v5, %v636_v22  ;;  %v766_v53 = vadd.f32 %v1879_v0, %v636_v22  ;;  %v622_v0 = vld [vmem:[%s2065_s3 + $0x38] sm:$0xff] }
 0x1fb   : > { %1361 = vmatprep.subr.bf16.mxu1 %v1360_v54 }
 0x1fc   : > { %1363 = vmatpush3.bf16.msra.mxu1 %v1360_v54 }
 0x1ff   : > { %1351 = vmatmul.mubr.msk.f32.vlgmr.msra.gmra.mrb[8].mxu1 %vm910_vm15, %v907_v55 }
 0x200   : > { %1353 = vmatprep.mubr.msk.f32.mxu1 %vm910_vm15, %v908_v56 }
 0x203   : > { %1354 = vmatmul.mubr.msk.f32.gmra.mrb[10].mxu1 %vm910_vm15, %v909_v57  ;;  %v621_v57 = vld [vmem:[%s2065_s3 + $0x30] sm:$0xff] }
 0x2d2   : > { %v1352_v4 = vpop.f32.mrb[8].mxu1 }
 0x2d3   : > { %1015 = vperm.xlu1 %1450, %v1352_v4   ;;  %v989_v6 = vpop.f32.mrb[9].mxu1 }
 0x2d6   : > { %v1355_v7 = vpop.f32.mrb[10].mxu1 }
 0x2d7   : > { %1010 = vperm.xlu1 %1450, %v989_v6   ;;  %v999_v8 = vpop.f32.mrb[11].mxu1 }
 0x2db   : > { %1020 = vperm.xlu1 %1450, %v999_v8  }
 0x2df   : > { %1025 = vperm.xlu1 %1450, %v1355_v7   ;;  %v1115_v7 = vpop.permute.xlu0 %1114 }
 0x2e3   : > { %1119 = vperm.xlu1 %1450, %v1109_v9   ;;  %v1969_v9 = vpop.permute.xlu0 %1161 }
 0x2e7   : > { %1124 = vperm.xlu1 %1450, %v1110_v10  }
 0x2eb   : > { %1129 = vperm.xlu1 %1450, %v1111_v11   ;;  %v651_v11 = vpop.permute.xlu0 %650 }
 0x2ef   : > { %1146 = vperm.xlu1 %1450, %v1140_v12  }
 0x2f3   : > { %1151 = vperm.xlu1 %1450, %v1141_v13  }
 0x2f7   : > { %1156 = vperm.xlu1 %1450, %v1142_v14  }
 0x2fb   : > { %645 = vperm.xlu1 %1450, %v619_v17  }
 0x352   : > { %v1016_v26 = vpop.permute.xlu1 %1015 }
 0x353   : > { %v1913_v27 = vadd.f32 %v1016_v26, %v758_v24  ;;  %v1915_v28 = vadd.f32 %v1016_v26, %v760_v25 }
 0x355   : > { %v1039_v31 = vadd.f32 %v1915_v28, %v1913_v27  ;;  %v1050_v40 = vmul.f32 %v1913_v27, %v1913_v27  ;;  %v1051_v41 = vmul.f32 %v1915_v28, %v1915_v28 }
 0x356   : > { %v1011_v32 = vpop.permute.xlu1 %1010 }
 0x357   : > { %v1919_v37 = vadd.f32 %v1011_v32, %v754_v29  ;;  %v1921_v38 = vadd.f32 %v1011_v32, %v756_v30  ;;  %1040 = vadd.xlane.f32.xlu1 %v1039_v31  ;;  %v1059_v43 = vadd.f32 %v1051_v41, %v1050_v40 }
 0x359   : > { %v1036_v39 = vadd.f32 %v1921_v38, %v1919_v37  ;;  %v1048_v44 = vmul.f32 %v1919_v37, %v1919_v37  ;;  %v1049_v45 = vmul.f32 %v1921_v38, %v1921_v38 }
 0x35a   : > { %v1021_v42 = vpop.permute.xlu1 %1020 }
 0x35b   : > { %1037 = vadd.xlane.f32.xlu0 %v1036_v39  ;;  %v1056_v51 = vadd.f32 %v1049_v45, %v1048_v44  ;;  %v1939_v54 = vadd.f32 %v1021_v42, %v764_v52  ;;  %v1941_v55 = vadd.f32 %v1021_v42, %v766_v53 }
 0x35d   : > { %v1042_v58 = vadd.f32 %v1941_v55, %v1939_v54  ;;  %v1052_v62 = vmul.f32 %v1939_v54, %v1939_v54  ;;  %v1053_v63 = vmul.f32 %v1941_v55, %v1941_v55 }
 0x35e   : > { %v1026_v46 = vpop.permute.xlu1 %1025 }
 0x35f   : > { %1060 = vadd.xlane.f32.xlu0 %v1059_v43  ;;  %v1933_v49 = vadd.f32 %v1026_v46, %v768_v47  ;;  %v1935_v50 = vadd.f32 %v1026_v46, %v770_v48  ;;  %v1062_v5 = vadd.f32 %v1053_v63, %v1052_v62 }
 0x361   : > { %v1045_v56 = vadd.f32 %v1935_v50, %v1933_v49  ;;  %v1054_v59 = vmul.f32 %v1933_v49, %v1933_v49  ;;  %v1055_v60 = vmul.f32 %v1935_v50, %v1935_v50 }
 0x362   : > { %v1120_v1 = vpop.permute.xlu1 %1119 }
 0x363   : > { %1057 = vadd.xlane.f32.xlu0 %v1056_v51  ;;  %v1065_v61 = vadd.f32 %v1055_v60, %v1054_v59 }
 0x366   : > { %v1961_v2 = vpop.permute.xlu1 %1124 }
 0x367   : > { %1046 = vadd.xlane.f32.xlu0 %v1045_v56 }
 0x368   : > { %655 = vperm.xlu1 %1450, %v621_v57  }
 0x36a   : > { %v1963_v3 = vpop.permute.xlu1 %1129 }
 0x36b   : > { %1043 = vadd.xlane.f32.xlu0 %v1042_v58 }
 0x36e   : > { %v1965_v4 = vpop.permute.xlu1 %1146 }
 0x36f   : > { %1066 = vadd.xlane.f32.xlu0 %v1065_v61 }
 0x372   : > { %v1152_v6 = vpop.permute.xlu1 %1151 }
 0x373   : > { %1063 = vadd.xlane.f32.xlu0 %v1062_v5 }
 0x376   : > { %v1967_v8 = vpop.permute.xlu1 %1156 }
 0x37a   : > { %v646_v10 = vpop.permute.xlu1 %645 }
 0x389   : > { %660 = vperm.xlu0 %1451, %v622_v0  }
 0x3e4   : > { %v1041_v12 = vpop.xlane.xlu1 %1040 }
 0x3e5   : > { %v1069_v14 = vmul.f32 0.00390625, %v1041_v12  ;;  %v778_v12 = vadd.f32 %v1909_v18, %v651_v11  ;;  %v776_v18 = vadd.f32 %v1904_v16, %v646_v10 }
 0x3e7   : > { %v1077_v21 = vmul.f32 %v1069_v14, %v1069_v14  ;;  %v1086_v41 = vsub.f32 %v1913_v27, %v1069_v14  ;;  %v1087_v42 = vsub.f32 %v1915_v28, %v1069_v14 }
 0x3e8   : > { %v1038_v13 = vpop.xlane.xlu0 %1037 }
 0x3e9   : > { %v1068_v20 = vmul.f32 0.00390625, %v1038_v13  ;;  %v780_v13 = vadd.f32 %v1911_v19, %v651_v11 }
 0x3eb   : > { %v1076_v26 = vmul.f32 %v1068_v20, %v1068_v20  ;;  %v1084_v53 = vsub.f32 %v1919_v37, %v1068_v20  ;;  %v1085_v56 = vsub.f32 %v1921_v38, %v1068_v20 }
 0x3ec   : > { %v1061_v17 = vpop.xlane.xlu0 %1060 }
 0x3ed   : > { %v1073_v22 = vmul.f32 0.00390625, %v1061_v17 }
 0x3ef   : > { %v1081_v23 = vsub.f32 %v1073_v22, %v1077_v21 }
 0x3f0   : > { %v1058_v24 = vpop.xlane.xlu0 %1057 }
 0x3f1   : > { %v1093_v25 = vadd.f32 1e-05, %v1081_v23  ;;  %v1072_v29 = vmul.f32 0.00390625, %v1058_v24 }
 0x3f3   : > { %1464 = vrsqrt.f32 %v1093_v25  ;;  %v1080_v30 = vsub.f32 %v1072_v29, %v1076_v26 }
 0x3f4   : > { %v1047_v31 = vpop.xlane.xlu0 %1046 }
 0x3f5   : > { %v1092_v32 = vadd.f32 1e-05, %v1080_v30  ;;  %v1071_v40 = vmul.f32 0.00390625, %v1047_v31 }
 0x3f7   : > { %1466 = vrsqrt.f32 %v1092_v32  ;;  %v1079_v46 = vmul.f32 %v1071_v40, %v1071_v40 }
 0x3f8   : > { %v1044_v39 = vpop.xlane.xlu0 %1043 }
 0x3f9   : > { %v1070_v45 = vmul.f32 0.00390625, %v1044_v39 }
 0x3fb   : > { %v1078_v28 = vmul.f32 %v1070_v45, %v1070_v45  ;;  %v1088_v29 = vsub.f32 %v1939_v54, %v1070_v45  ;;  %v1089_v30 = vsub.f32 %v1941_v55, %v1070_v45 }
 0x3fc   : > { %v1067_v43 = vpop.xlane.xlu0 %1066 }
 0x3fd   : > { %v1465_v44 = vpop.eup %1464  ;;  %v1075_v47 = vmul.f32 0.00390625, %v1067_v43 }
 0x3fe   : > { %v1102_v48 = vmul.f32 %v1465_v44, %v1086_v41  ;;  %v1103_v51 = vmul.f32 %v1465_v44, %v1087_v42 }
 0x3ff   : > { %v1083_v52 = vsub.f32 %v1075_v47, %v1079_v46  ;;  %v656_v46 = vpop.permute.xlu1 %655 }
 0x400   : > { %v1134_v57 = vmul.f32 %v1120_v1, %v1102_v48  ;;  %v1135_v58 = vmul.f32 %v1120_v1, %v1103_v51  ;;  %v1064_v59 = vpop.xlane.xlu0 %1063  ;;  %v786_v51 = vadd.f32 %v1841_v34, %v656_v46 }
 0x401   : > { %v1467_v27 = vpop.eup %1466  ;;  %v1095_v60 = vadd.f32 1e-05, %v1083_v52  ;;  %v1074_v61 = vmul.f32 0.00390625, %v1064_v59 }
 0x402   : > { %v1166_v62 = vadd.f32 %v1152_v6, %v1134_v57  ;;  %v1167_v63 = vadd.f32 %v1152_v6, %v1135_v58  ;;  %v1100_v5 = vmul.f32 %v1467_v27, %v1084_v53  ;;  %v1101_v0 = vmul.f32 %v1467_v27, %v1085_v56 }
 0x403   : > { %1468 = vrsqrt.f32 %v1095_v60  ;;  %v1082_v37 = vsub.f32 %v1074_v61, %v1078_v28  ;;  %v774_v6 = vadd.f32 %v1902_v15, %v646_v10  ;;  %v1091_v15 = vsub.f32 %v1935_v50, %v1071_v40 }
 0x404   : > { %v1174_v38 = vmax.f32 %v1166_v62, 0.0  ;;  %v1175_v14 = vmax.f32 %v1167_v63, 0.0  ;;  %v1132_v1 = vmul.f32 %v1115_v7, %v1100_v5  ;;  %v1133_v17 = vmul.f32 %v1115_v7, %v1101_v0 }
 0x405   : > { %v1094_v20 = vadd.f32 1e-05, %v1082_v37 }
 0x406   : > { %v1182_v21 = vadd.f32 %v1174_v38, %v778_v12  ;;  %v1183_v22 = vadd.f32 %v1175_v14, %v780_v13  ;;  %v1164_v23 = vadd.f32 %v1965_v4, %v1132_v1  ;;  %v1165_v24 = vadd.f32 %v1965_v4, %v1133_v17 }
 0x407   : > { %1470 = vrsqrt.f32 %v1094_v20  ;;  %v1090_v4 = vsub.f32 %v1933_v49, %v1071_v40 }
 0x408   : > { %1190 = vst [vmem:[%s1984_s22 + $0x10] sm:$0xff] %v1182_v21  ;;  %1191 = vst [vmem:[%s1984_s22 + $0x18] sm:$0xff] %v1183_v22  ;;  %v1172_v19 = vmax.f32 %v1164_v23, 0.0  ;;  %v1173_v7 = vmax.f32 %v1165_v24, 0.0  ;;  %v661_v39 = vpop.permute.xlu0 %660 }
 0x409   : > { %v788_v40 = vadd.f32 %v1843_v35, %v661_v39  ;;  %v790_v54 = vadd.f32 %v1845_v36, %v661_v39  ;;  %v784_v36 = vadd.f32 %v1839_v33, %v656_v46 }
 0x40a   : > { %v1180_v11 = vadd.f32 %v1172_v19, %v774_v6  ;;  %v1181_v25 = vadd.f32 %v1173_v7, %v776_v18 }
 0x40c   : > { %1188 = vst [vmem:[%s1984_s22] sm:$0xff] %v1180_v11  ;;  %1189 = vst [vmem:[%s1984_s22 + $0x8] sm:$0xff] %v1181_v25 }
 0x40d   : > { %v1469_v26 = vpop.eup %1468 }
 0x40e   : > { %v1106_v16 = vmul.f32 %v1469_v26, %v1090_v4  ;;  %v1107_v10 = vmul.f32 %v1469_v26, %v1091_v15 }
 0x410   : > { %v1138_v31 = vmul.f32 %v1963_v3, %v1106_v16  ;;  %v1139_v32 = vmul.f32 %v1963_v3, %v1107_v10 }
 0x411   : > { %v1471_v41 = vpop.eup %1470 }
 0x412   : > { %v1104_v42 = vmul.f32 %v1471_v41, %v1088_v29  ;;  %v1105_v43 = vmul.f32 %v1471_v41, %v1089_v30  ;;  %v1170_v49 = vadd.f32 %v1969_v9, %v1138_v31  ;;  %v1171_v50 = vadd.f32 %v1969_v9, %v1139_v32 }
 0x414   : > { %v1136_v55 = vmul.f32 %v1961_v2, %v1104_v42  ;;  %v1137_v3 = vmul.f32 %v1961_v2, %v1105_v43  ;;  %v1178_v44 = vmax.f32 %v1170_v49, 0.0  ;;  %v1179_v45 = vmax.f32 %v1171_v50, 0.0 }
 0x416   : > { %v1168_v47 = vadd.f32 %v1967_v8, %v1136_v55  ;;  %v1169_v48 = vadd.f32 %v1967_v8, %v1137_v3  ;;  %v1186_v9 = vadd.f32 %v1178_v44, %v788_v40  ;;  %v1187_v35 = vadd.f32 %v1179_v45, %v790_v54 }
 0x418   : > { %v1176_v2 = vmax.f32 %v1168_v47, 0.0  ;;  %v1177_v52 = vmax.f32 %v1169_v48, 0.0  ;;  %1194 = vst [vmem:[%s1984_s22 + $0x30] sm:$0xff] %v1186_v9  ;;  %1195 = vst [vmem:[%s1984_s22 + $0x38] sm:$0xff] %v1187_v35 }
 0x41a   : > { %v1184_v8 = vadd.f32 %v1176_v2, %v784_v36  ;;  %v1185_v53 = vadd.f32 %v1177_v52, %v786_v51 }
 0x41c   : > { %1192 = vst [vmem:[%s1984_s22 + $0x20] sm:$0xff] %v1184_v8  ;;  %1193 = vst [vmem:[%s1984_s22 + $0x28] sm:$0xff] %v1185_v53 }
 0x41d   : > { %1513 = shalt.err (!%p1510_p7)
}
 0x41e   : > { %s1514_s21 = scalar_lea.hbm %s2013_s29, 1024  ;;  %s1518_s25 = scalar_lea.hbm %s2071_s9, 2048 }
 0x41f   : > { %p1515_p8 = scmp.ne.s32.totalorder %s2013_s29, %s1514_s21  ;;  %p1519_p1 = scmp.lt.u32.totalorder %s2013_s29, %s2071_s9 }
 0x420   : > { %p1520_p0 = scmp.lt.u32.totalorder %s1518_s25, %s1514_s21  ;;  %p1522_p6 = scmp.lt.u32.totalorder %s1514_s21, %s2013_s29 }
 0x421   : > { %p1516_p11 = pnand %p1515_p8, %p2082_p9 }
 0x422   : > { %p1521_p5 = por %p1520_p0, %p1519_p1 }
 0x423   : > { %p1517_p13 = pneg %p1516_p11 }
 0x424   : > { %p1523_p10 = por %p1522_p6, %p1521_p5 }
 0x426   : > { %p1524_p12 = pnand %p1523_p10, %p1517_p13 }
 0x428   : > { %1527 = shalt.err (!%p1524_p12)
}
 0x429   : > { %s1586_s14 = smov 256   ;;  %s1587_s24 = smov 16  }
 0x42a   : > { %1386 = dma.vmem_to_hbm [thread:$0]  (%p2082_p9), %s2015_s26, 1024, %s2013_s29, %s2021_s13, %s1586_s14, %s1586_s14, %s1587_s24  }
 0x42b PF: > { %p1398_p2 = scmp.ge.s32.totalorder %s1566_s12, 2  ;;  %s1225_s16 = sand.u32 1, %s1554_s30  }
 0x42c   : > { %p2083_p3 = scmp.ne.s32.totalorder %s2076_s20, 0  ;;  %s1226_s23 = scalar_lea.sflag [#allocation5], %s1225_s16 }
 0x42e   : > { %p1393_p4 = pnand %p1398_p2, %p2083_p3 }
 0x430   : > { %1549 = dma.done.wait (!%p1393_p4), %s1226_s23, 1024  }
 0x431   : > { %1551 = vsyncadd (!%p1393_p4), %s1226_s23, 4294966272  ;;  %p20_p7 = scmp.ge.s32.totalorder %s1663_s15, 4   ;;  %s2084_s30 = smov %s1558_s10 }
 0x432   : > { %s2085_s10 = smov %s1562_s11  ;;  %s2086_s11 = smov %s1674_s18 }
 0x433   : > { %s2087_s12 = smov %s1663_s15  ;;  %22 = sbr.rel (!%p20_p7) target bundleno = 4 (0x4), region = 111 }
 0x43a   :  { %1231 = vsyncpa [#allocation4], 1 }
 0x43b   :  { %1233 = vsyncpa [#allocation4 + $0x1], 1 }
 0x43c   :  { %1234 = vsyncpa [#allocation5], 1 }
 0x43d   :  { %1236 = vsyncpa [#allocation5 + $0x1], 1 }

</bundles_post_ra>
